<compile_context>
chip_gen: v6e
topology: v6e:2x2x1
jax: 0.10.0
libtpu: 0.0.40
codegen_flags: <defaults>
</compile_context>

<pallas_src>
import jax
import jax.numpy as jnp
from jax.experimental import pallas as pl
from jax.experimental.pallas import tpu as pltpu

# ----- module hyper-params (shrunk from dims=[200,10,10,10,10], hidden=200) -----
dims = [16, 8, 8, 8, 8]
hidden_dim = 32
request_len = [1]
embedding_len = [0, 1, 2, 3, 4]
nums = [6, 5, 4, 3, 7]            # stand-in for infos[11:16, 2]
tagset_size = 8
seq_len = 8
feat_dim = len(request_len) + sum(dims[i] for i in embedding_len)   # 1 + 48 = 49


# ---------------------------- Pallas kernel ----------------------------
def lstm_tagger_kernel(idx_ref, raw_ref, wraw_ref, b_ref,
                       pt0_ref, pt1_ref, pt2_ref, pt3_ref, pt4_ref,
                       whh_ref, wout_ref, bout_ref,
                       out_ref, h_scratch):
    """Single-block kernel: fused embedding gather + LSTM recurrence + tagger.

    idx_ref:   (S, 5)   int32  SMEM   embedding indices per timestep
    raw_ref:   (S, 1)   f32    SMEM   raw request feature(s)
    wraw_ref:  (1, 4H)  f32    VMEM   W_ih row(s) for the raw feature
    b_ref:     (1, 4H)  f32    VMEM   b_ih + b_hh (pre-folded)
    pt*_ref:   (V_i, 1, 4H) f32 VMEM  embedding tables pre-projected by W_ih blocks
    whh_ref:   (H, 4H)  bf16   VMEM   recurrent weights (transposed, bf16)
    wout_ref:  (H, T)   bf16   VMEM   hidden2tag weights (transposed, bf16)
    bout_ref:  (1, T)   f32    VMEM
    out_ref:   (S, T)   f32    VMEM
    h_scratch: (S, H)   f32    VMEM scratch for per-step hidden states
    """
    S = out_ref.shape[0]
    H = whh_ref.shape[0]
    G = 4 * H
    ptabs = (pt0_ref, pt1_ref, pt2_ref, pt3_ref, pt4_ref)

    # Per-lane affine map so ONE tanh over the whole (1, 4H) gates vreg yields
    # all four activations: sigmoid(x) = 0.5*tanh(0.5x) + 0.5 on i/f/o lanes,
    # tanh(x) on g lanes.  Hoisted out of the time loop.
    lane = jax.lax.broadcasted_iota(jnp.int32, (1, G), 1)
    is_g = jnp.logical_and(lane >= 2 * H, lane < 3 * H)
    gscale = jnp.where(is_g, 1.0, 0.5).astype(jnp.float32)
    gbias = 1.0 - gscale

    wraw = wraw_ref[...]           # (1, 4H) f32
    bias = b_ref[...]              # (1, 4H) f32
    whh = whh_ref[...]             # (H, 4H) bf16, held resident across the loop

    # ---- fused embedding gather + input projection (off the recurrence path) --
    # x_proj[t] = b + raw[t] * W_ih_raw + sum_i (table_i @ W_ih_block_i)[idx[t,i]]
    xp_rows = []
    for t in range(S):
        row = bias + raw_ref[t, 0] * wraw
        for i, pt in enumerate(ptabs):
            row = row + pt[idx_ref[t, i]]          # dynamic (1, 4H) row read
        xp_rows.append(row)

    # ---- recurrence: h/c carried as vreg values, fully-unrolled static loop ---
    h = jnp.zeros((1, H), jnp.float32)
    c = jnp.zeros((1, H), jnp.float32)
    for t in range(S):
        gates = xp_rows[t] + jnp.dot(h.astype(jnp.bfloat16), whh,
                                     preferred_element_type=jnp.float32)
        act = gscale * jnp.tanh(gates * gscale) + gbias   # one EUP push, all gates
        i_g = act[:, 0:H]
        f_g = act[:, H:2 * H]
        g_g = act[:, 2 * H:3 * H]
        o_g = act[:, 3 * H:4 * H]
        c = f_g * c + i_g * g_g
        h = o_g * jnp.tanh(c)
        h_scratch[pl.ds(t, 1), :] = h

    # ---- deferred tag projection: one (S,H)@(H,T) bf16 matmul + single store --
    out_ref[...] = (jnp.dot(h_scratch[...].astype(jnp.bfloat16), wout_ref[...],
                            preferred_element_type=jnp.float32)
                    + bout_ref[...])


# ------------------- one-time parameter preparation (off hot path) -------------
def prepare_lstm_params(params, embeddings):
    """Transposes, bias fold, bf16 casts, and W_ih pre-projection of the
    embedding tables — all hoisted out of the per-call forward path."""
    H = hidden_dim
    w_ih_t = jnp.asarray(params["w_ih"], jnp.float32).T            # (feat, 4H)
    n_raw = len(request_len)

    ptabs = []
    off = n_raw
    for i in embedding_len:
        blk = w_ih_t[off:off + dims[i], :]                          # (dims[i], 4H)
        tab = jnp.dot(embeddings[i].astype(jnp.float32), blk)       # (vocab_i, 4H)
        ptabs.append(tab[:, None, :])                               # (vocab_i, 1, 4H)
        off += dims[i]

    return {
        "wraw": w_ih_t[0:n_raw, :],                                                    # (1, 4H)
        "b": (params["b_ih"] + params["b_hh"]).reshape(1, 4 * H).astype(jnp.float32),  # (1, 4H)
        "ptabs": tuple(ptabs),
        "whh_bf": jnp.asarray(params["w_hh"], jnp.float32).T.astype(jnp.bfloat16),     # (H, 4H)
        "wout_bf": jnp.asarray(params["w_out"], jnp.float32).T.astype(jnp.bfloat16),   # (H, T)
        "bout": params["b_out"].reshape(1, -1).astype(jnp.float32),                    # (1, T)
    }


@jax.jit
def lstm_tagger_forward(seq, prepped):
    """seq: (seq_len, 16) int32 request rows -> (seq_len, tagset_size) f32 scores."""
    S = seq.shape[0]
    H = prepped["whh_bf"].shape[0]
    T = prepped["bout"].shape[1]

    # Column extraction fused into the same jit/dispatch as the kernel.
    idx = seq[:, 11:11 + len(embedding_len)].astype(jnp.int32)                  # (S, 5)
    raw = jnp.stack([seq[:, 7 + i] for i in request_len], axis=1).astype(jnp.float32)  # (S, 1)

    smem = pl.BlockSpec(memory_space=pltpu.MemorySpace.SMEM)
    vmem = pl.BlockSpec(memory_space=pltpu.MemorySpace.VMEM)
    n_vmem_inputs = 2 + len(prepped["ptabs"]) + 3                   # wraw,b + tables + whh,wout,bout

    return pl.pallas_call(
        lstm_tagger_kernel,
        out_shape=jax.ShapeDtypeStruct((S, T), jnp.float32),
        in_specs=[smem, smem] + [vmem] * n_vmem_inputs,
        out_specs=vmem,
        scratch_shapes=[pltpu.VMEM((S, H), jnp.float32)],
    )(idx, raw, prepped["wraw"], prepped["b"], *prepped["ptabs"],
      prepped["whh_bf"], prepped["wout_bf"], prepped["bout"])


# ---------------------------- pure-JAX reference (f32) ----------------------------
def prepare_sequence(seq_row, embeddings):
    """Mirror of the reference prepare_sequence: raw feature(s) + concatenated
    embedding lookups -> one (feat_dim,) vector."""
    parts = [jnp.array([seq_row[7 + i] for i in request_len], dtype=jnp.float32)]
    for i in embedding_len:
        parts.append(embeddings[i][seq_row[11 + i].astype(jnp.int32)])
    return jnp.concatenate(parts)


def lstm_tagger_reference(seq, embeddings, params):
    """Exact-f32 reference (PyTorch gate order [i,f,g,o]) for validation."""
    S = seq.shape[0]
    H = hidden_dim
    embeds = jnp.stack([prepare_sequence(seq[t], embeddings) for t in range(S)])
    b = params["b_ih"] + params["b_hh"]
    h = jnp.zeros((H,), jnp.float32)
    c = jnp.zeros((H,), jnp.float32)
    hs = []
    for t in range(S):
        g = embeds[t] @ params["w_ih"].T + h @ params["w_hh"].T + b
        i_g = jax.nn.sigmoid(g[0:H])
        f_g = jax.nn.sigmoid(g[H:2 * H])
        g_g = jnp.tanh(g[2 * H:3 * H])
        o_g = jax.nn.sigmoid(g[3 * H:4 * H])
        c = f_g * c + i_g * g_g
        h = o_g * jnp.tanh(c)
        hs.append(h)
    hs = jnp.stack(hs)
    return hs @ params["w_out"].T + params["b_out"][None, :]


# ---------------------------- main ----------------------------
if __name__ == "__main__":
    key = jax.random.PRNGKey(0)
    keys = jax.random.split(key, 12)

    # Embedding tables (nn.Embedding default init ~ N(0, 1)).
    embeddings = [jax.random.normal(keys[i], (nums[i], dims[i]), jnp.float32)
                  for i in range(5)]

    # LSTM / Linear params (PyTorch-style uniform(-1/sqrt(H), 1/sqrt(H))).
    k = hidden_dim ** -0.5
    params = {
        "w_ih": jax.random.uniform(keys[5], (4 * hidden_dim, feat_dim),
                                   jnp.float32, -k, k),
        "w_hh": jax.random.uniform(keys[6], (4 * hidden_dim, hidden_dim),
                                   jnp.float32, -k, k),
        "b_ih": jax.random.uniform(keys[7], (4 * hidden_dim,), jnp.float32, -k, k),
        "b_hh": jax.random.uniform(keys[8], (4 * hidden_dim,), jnp.float32, -k, k),
        "w_out": jax.random.uniform(keys[9], (tagset_size, hidden_dim),
                                    jnp.float32, -k, k),
        "b_out": jax.random.uniform(keys[10], (tagset_size,), jnp.float32, -k, k),
    }
    prepped = prepare_lstm_params(params, embeddings)   # one-time; not in hot path

    # Synthetic integer "request" sequence: (seq_len, 16); cols 11..15 are
    # embedding indices (modded into each vocab), col 8 is a raw feature.
    seq = jax.random.randint(keys[11], (seq_len, 16), 0, 100, dtype=jnp.int32)
    idx_cols = jnp.stack([seq[:, 11 + i] % nums[i] for i in range(5)], axis=1)
    seq = seq.at[:, 11:16].set(idx_cols)

    out = lstm_tagger_forward(seq, prepped)
    jax.block_until_ready(out)
    assert out.shape == (seq_len, tagset_size) and out.dtype == jnp.float32

    # Validate against the exact-f32 reference (kernel uses bf16 MXU operands,
    # f32 accumulation -> loose tolerance).
    ref = lstm_tagger_reference(seq, embeddings, params)
    max_err = float(jnp.max(jnp.abs(out - ref)))
    assert max_err < 7.5e-2, f"kernel vs reference mismatch: {max_err}"

    print("KERNEL_OK")
</pallas_src>

<mosaic_0001>
module attributes {stable_mosaic.version = 11 : i64} {
  func.func @lstm_tagger_kernel(%arg0: memref<8x5xi32, #tpu.memory_space<smem>>, %arg1: memref<8x1xf32, #tpu.memory_space<smem>>, %arg2: memref<1x128xf32, #tpu.memory_space<vmem>>, %arg3: memref<1x128xf32, #tpu.memory_space<vmem>>, %arg4: memref<6x1x128xf32, #tpu.memory_space<vmem>>, %arg5: memref<5x1x128xf32, #tpu.memory_space<vmem>>, %arg6: memref<4x1x128xf32, #tpu.memory_space<vmem>>, %arg7: memref<3x1x128xf32, #tpu.memory_space<vmem>>, %arg8: memref<7x1x128xf32, #tpu.memory_space<vmem>>, %arg9: memref<32x128xbf16, #tpu.memory_space<vmem>>, %arg10: memref<32x8xbf16, #tpu.memory_space<vmem>>, %arg11: memref<1x8xf32, #tpu.memory_space<vmem>>, %arg12: memref<8x8xf32, #tpu.memory_space<vmem>>, %arg13: memref<8x32xf32, #tpu.memory_space<vmem>>) attributes {dimension_semantics = [], scalar_prefetch = 0 : i64, scratch_operands = 1 : i64, tpu.core_type = #tpu.core_type<tc>} {
    %0 = tpu.iota {dimensions = array<i32: 1>} : vector<1x128xi32>
    %c64_i32 = arith.constant 64 : i32
    %1 = vector.broadcast %c64_i32 : i32 to vector<1x128xi32>
    %2 = arith.cmpi sge, %0, %1 : vector<1x128xi32>
    %c96_i32 = arith.constant 96 : i32
    %3 = vector.broadcast %c96_i32 : i32 to vector<1x128xi32>
    %4 = arith.cmpi slt, %0, %3 : vector<1x128xi32>
    %5 = arith.andi %2, %4 : vector<1x128xi1>
    %cst = arith.constant 1.000000e+00 : f32
    %cst_0 = arith.constant 5.000000e-01 : f32
    %6 = vector.broadcast %cst : f32 to vector<1x128xf32>
    %7 = vector.broadcast %cst_0 : f32 to vector<1x128xf32>
    %8 = arith.select %5, %6, %7 : vector<1x128xi1>, vector<1x128xf32>
    %cst_1 = arith.constant 1.000000e+00 : f32
    %9 = vector.broadcast %cst_1 : f32 to vector<1x128xf32>
    %10 = arith.subf %9, %8 : vector<1x128xf32>
    %c0 = arith.constant 0 : index
    %c0_2 = arith.constant 0 : index
    %11 = vector.load %arg2[%c0, %c0_2] : memref<1x128xf32, #tpu.memory_space<vmem>>, vector<1x128xf32>
    %c0_3 = arith.constant 0 : index
    %c0_4 = arith.constant 0 : index
    %12 = vector.load %arg3[%c0_3, %c0_4] : memref<1x128xf32, #tpu.memory_space<vmem>>, vector<1x128xf32>
    %c0_5 = arith.constant 0 : index
    %c0_6 = arith.constant 0 : index
    %13 = vector.load %arg9[%c0_5, %c0_6] : memref<32x128xbf16, #tpu.memory_space<vmem>>, vector<32x128xbf16>
    %c0_7 = arith.constant 0 : index
    %c0_8 = arith.constant 0 : index
    %14 = memref.load %arg1[%c0_7, %c0_8] : memref<8x1xf32, #tpu.memory_space<smem>>
    %15 = vector.broadcast %14 : f32 to vector<1x128xf32>
    %16 = arith.mulf %15, %11 : vector<1x128xf32>
    %17 = arith.addf %12, %16 : vector<1x128xf32>
    %c0_9 = arith.constant 0 : index
    %c0_10 = arith.constant 0 : index
    %18 = memref.load %arg0[%c0_9, %c0_10] : memref<8x5xi32, #tpu.memory_space<smem>>
    %19 = arith.index_cast %18 : i32 to index
    %c0_11 = arith.constant 0 : index
    %c0_12 = arith.constant 0 : index
    %20 = vector.load %arg4[%19, %c0_11, %c0_12] : memref<6x1x128xf32, #tpu.memory_space<vmem>>, vector<1x1x128xf32>
    %21 = vector.shape_cast %20 : vector<1x1x128xf32> to vector<1x128xf32>
    %22 = arith.addf %17, %21 : vector<1x128xf32>
    %c0_13 = arith.constant 0 : index
    %c1 = arith.constant 1 : index
    %23 = memref.load %arg0[%c0_13, %c1] : memref<8x5xi32, #tpu.memory_space<smem>>
    %24 = arith.index_cast %23 : i32 to index
    %c0_14 = arith.constant 0 : index
    %c0_15 = arith.constant 0 : index
    %25 = vector.load %arg5[%24, %c0_14, %c0_15] : memref<5x1x128xf32, #tpu.memory_space<vmem>>, vector<1x1x128xf32>
    %26 = vector.shape_cast %25 : vector<1x1x128xf32> to vector<1x128xf32>
    %27 = arith.addf %22, %26 : vector<1x128xf32>
    %c0_16 = arith.constant 0 : index
    %c2 = arith.constant 2 : index
    %28 = memref.load %arg0[%c0_16, %c2] : memref<8x5xi32, #tpu.memory_space<smem>>
    %29 = arith.index_cast %28 : i32 to index
    %c0_17 = arith.constant 0 : index
    %c0_18 = arith.constant 0 : index
    %30 = vector.load %arg6[%29, %c0_17, %c0_18] : memref<4x1x128xf32, #tpu.memory_space<vmem>>, vector<1x1x128xf32>
    %31 = vector.shape_cast %30 : vector<1x1x128xf32> to vector<1x128xf32>
    %32 = arith.addf %27, %31 : vector<1x128xf32>
    %c0_19 = arith.constant 0 : index
    %c3 = arith.constant 3 : index
    %33 = memref.load %arg0[%c0_19, %c3] : memref<8x5xi32, #tpu.memory_space<smem>>
    %34 = arith.index_cast %33 : i32 to index
    %c0_20 = arith.constant 0 : index
    %c0_21 = arith.constant 0 : index
    %35 = vector.load %arg7[%34, %c0_20, %c0_21] : memref<3x1x128xf32, #tpu.memory_space<vmem>>, vector<1x1x128xf32>
    %36 = vector.shape_cast %35 : vector<1x1x128xf32> to vector<1x128xf32>
    %37 = arith.addf %32, %36 : vector<1x128xf32>
    %c0_22 = arith.constant 0 : index
    %c4 = arith.constant 4 : index
    %38 = memref.load %arg0[%c0_22, %c4] : memref<8x5xi32, #tpu.memory_space<smem>>
    %39 = arith.index_cast %38 : i32 to index
    %c0_23 = arith.constant 0 : index
    %c0_24 = arith.constant 0 : index
    %40 = vector.load %arg8[%39, %c0_23, %c0_24] : memref<7x1x128xf32, #tpu.memory_space<vmem>>, vector<1x1x128xf32>
    %41 = vector.shape_cast %40 : vector<1x1x128xf32> to vector<1x128xf32>
    %42 = arith.addf %37, %41 : vector<1x128xf32>
    %c1_25 = arith.constant 1 : index
    %c0_26 = arith.constant 0 : index
    %43 = memref.load %arg1[%c1_25, %c0_26] : memref<8x1xf32, #tpu.memory_space<smem>>
    %44 = vector.broadcast %43 : f32 to vector<1x128xf32>
    %45 = arith.mulf %44, %11 : vector<1x128xf32>
    %46 = arith.addf %12, %45 : vector<1x128xf32>
    %c1_27 = arith.constant 1 : index
    %c0_28 = arith.constant 0 : index
    %47 = memref.load %arg0[%c1_27, %c0_28] : memref<8x5xi32, #tpu.memory_space<smem>>
    %48 = arith.index_cast %47 : i32 to index
    %c0_29 = arith.constant 0 : index
    %c0_30 = arith.constant 0 : index
    %49 = vector.load %arg4[%48, %c0_29, %c0_30] : memref<6x1x128xf32, #tpu.memory_space<vmem>>, vector<1x1x128xf32>
    %50 = vector.shape_cast %49 : vector<1x1x128xf32> to vector<1x128xf32>
    %51 = arith.addf %46, %50 : vector<1x128xf32>
    %c1_31 = arith.constant 1 : index
    %c1_32 = arith.constant 1 : index
    %52 = memref.load %arg0[%c1_31, %c1_32] : memref<8x5xi32, #tpu.memory_space<smem>>
    %53 = arith.index_cast %52 : i32 to index
    %c0_33 = arith.constant 0 : index
    %c0_34 = arith.constant 0 : index
    %54 = vector.load %arg5[%53, %c0_33, %c0_34] : memref<5x1x128xf32, #tpu.memory_space<vmem>>, vector<1x1x128xf32>
    %55 = vector.shape_cast %54 : vector<1x1x128xf32> to vector<1x128xf32>
    %56 = arith.addf %51, %55 : vector<1x128xf32>
    %c1_35 = arith.constant 1 : index
    %c2_36 = arith.constant 2 : index
    %57 = memref.load %arg0[%c1_35, %c2_36] : memref<8x5xi32, #tpu.memory_space<smem>>
    %58 = arith.index_cast %57 : i32 to index
    %c0_37 = arith.constant 0 : index
    %c0_38 = arith.constant 0 : index
    %59 = vector.load %arg6[%58, %c0_37, %c0_38] : memref<4x1x128xf32, #tpu.memory_space<vmem>>, vector<1x1x128xf32>
    %60 = vector.shape_cast %59 : vector<1x1x128xf32> to vector<1x128xf32>
    %61 = arith.addf %56, %60 : vector<1x128xf32>
    %c1_39 = arith.constant 1 : index
    %c3_40 = arith.constant 3 : index
    %62 = memref.load %arg0[%c1_39, %c3_40] : memref<8x5xi32, #tpu.memory_space<smem>>
    %63 = arith.index_cast %62 : i32 to index
    %c0_41 = arith.constant 0 : index
    %c0_42 = arith.constant 0 : index
    %64 = vector.load %arg7[%63, %c0_41, %c0_42] : memref<3x1x128xf32, #tpu.memory_space<vmem>>, vector<1x1x128xf32>
    %65 = vector.shape_cast %64 : vector<1x1x128xf32> to vector<1x128xf32>
    %66 = arith.addf %61, %65 : vector<1x128xf32>
    %c1_43 = arith.constant 1 : index
    %c4_44 = arith.constant 4 : index
    %67 = memref.load %arg0[%c1_43, %c4_44] : memref<8x5xi32, #tpu.memory_space<smem>>
    %68 = arith.index_cast %67 : i32 to index
    %c0_45 = arith.constant 0 : index
    %c0_46 = arith.constant 0 : index
    %69 = vector.load %arg8[%68, %c0_45, %c0_46] : memref<7x1x128xf32, #tpu.memory_space<vmem>>, vector<1x1x128xf32>
    %70 = vector.shape_cast %69 : vector<1x1x128xf32> to vector<1x128xf32>
    %71 = arith.addf %66, %70 : vector<1x128xf32>
    %c2_47 = arith.constant 2 : index
    %c0_48 = arith.constant 0 : index
    %72 = memref.load %arg1[%c2_47, %c0_48] : memref<8x1xf32, #tpu.memory_space<smem>>
    %73 = vector.broadcast %72 : f32 to vector<1x128xf32>
    %74 = arith.mulf %73, %11 : vector<1x128xf32>
    %75 = arith.addf %12, %74 : vector<1x128xf32>
    %c2_49 = arith.constant 2 : index
    %c0_50 = arith.constant 0 : index
    %76 = memref.load %arg0[%c2_49, %c0_50] : memref<8x5xi32, #tpu.memory_space<smem>>
    %77 = arith.index_cast %76 : i32 to index
    %c0_51 = arith.constant 0 : index
    %c0_52 = arith.constant 0 : index
    %78 = vector.load %arg4[%77, %c0_51, %c0_52] : memref<6x1x128xf32, #tpu.memory_space<vmem>>, vector<1x1x128xf32>
    %79 = vector.shape_cast %78 : vector<1x1x128xf32> to vector<1x128xf32>
    %80 = arith.addf %75, %79 : vector<1x128xf32>
    %c2_53 = arith.constant 2 : index
    %c1_54 = arith.constant 1 : index
    %81 = memref.load %arg0[%c2_53, %c1_54] : memref<8x5xi32, #tpu.memory_space<smem>>
    %82 = arith.index_cast %81 : i32 to index
    %c0_55 = arith.constant 0 : index
    %c0_56 = arith.constant 0 : index
    %83 = vector.load %arg5[%82, %c0_55, %c0_56] : memref<5x1x128xf32, #tpu.memory_space<vmem>>, vector<1x1x128xf32>
    %84 = vector.shape_cast %83 : vector<1x1x128xf32> to vector<1x128xf32>
    %85 = arith.addf %80, %84 : vector<1x128xf32>
    %c2_57 = arith.constant 2 : index
    %c2_58 = arith.constant 2 : index
    %86 = memref.load %arg0[%c2_57, %c2_58] : memref<8x5xi32, #tpu.memory_space<smem>>
    %87 = arith.index_cast %86 : i32 to index
    %c0_59 = arith.constant 0 : index
    %c0_60 = arith.constant 0 : index
    %88 = vector.load %arg6[%87, %c0_59, %c0_60] : memref<4x1x128xf32, #tpu.memory_space<vmem>>, vector<1x1x128xf32>
    %89 = vector.shape_cast %88 : vector<1x1x128xf32> to vector<1x128xf32>
    %90 = arith.addf %85, %89 : vector<1x128xf32>
    %c2_61 = arith.constant 2 : index
    %c3_62 = arith.constant 3 : index
    %91 = memref.load %arg0[%c2_61, %c3_62] : memref<8x5xi32, #tpu.memory_space<smem>>
    %92 = arith.index_cast %91 : i32 to index
    %c0_63 = arith.constant 0 : index
    %c0_64 = arith.constant 0 : index
    %93 = vector.load %arg7[%92, %c0_63, %c0_64] : memref<3x1x128xf32, #tpu.memory_space<vmem>>, vector<1x1x128xf32>
    %94 = vector.shape_cast %93 : vector<1x1x128xf32> to vector<1x128xf32>
    %95 = arith.addf %90, %94 : vector<1x128xf32>
    %c2_65 = arith.constant 2 : index
    %c4_66 = arith.constant 4 : index
    %96 = memref.load %arg0[%c2_65, %c4_66] : memref<8x5xi32, #tpu.memory_space<smem>>
    %97 = arith.index_cast %96 : i32 to index
    %c0_67 = arith.constant 0 : index
    %c0_68 = arith.constant 0 : index
    %98 = vector.load %arg8[%97, %c0_67, %c0_68] : memref<7x1x128xf32, #tpu.memory_space<vmem>>, vector<1x1x128xf32>
    %99 = vector.shape_cast %98 : vector<1x1x128xf32> to vector<1x128xf32>
    %100 = arith.addf %95, %99 : vector<1x128xf32>
    %c3_69 = arith.constant 3 : index
    %c0_70 = arith.constant 0 : index
    %101 = memref.load %arg1[%c3_69, %c0_70] : memref<8x1xf32, #tpu.memory_space<smem>>
    %102 = vector.broadcast %101 : f32 to vector<1x128xf32>
    %103 = arith.mulf %102, %11 : vector<1x128xf32>
    %104 = arith.addf %12, %103 : vector<1x128xf32>
    %c3_71 = arith.constant 3 : index
    %c0_72 = arith.constant 0 : index
    %105 = memref.load %arg0[%c3_71, %c0_72] : memref<8x5xi32, #tpu.memory_space<smem>>
    %106 = arith.index_cast %105 : i32 to index
    %c0_73 = arith.constant 0 : index
    %c0_74 = arith.constant 0 : index
    %107 = vector.load %arg4[%106, %c0_73, %c0_74] : memref<6x1x128xf32, #tpu.memory_space<vmem>>, vector<1x1x128xf32>
    %108 = vector.shape_cast %107 : vector<1x1x128xf32> to vector<1x128xf32>
    %109 = arith.addf %104, %108 : vector<1x128xf32>
    %c3_75 = arith.constant 3 : index
    %c1_76 = arith.constant 1 : index
    %110 = memref.load %arg0[%c3_75, %c1_76] : memref<8x5xi32, #tpu.memory_space<smem>>
    %111 = arith.index_cast %110 : i32 to index
    %c0_77 = arith.constant 0 : index
    %c0_78 = arith.constant 0 : index
    %112 = vector.load %arg5[%111, %c0_77, %c0_78] : memref<5x1x128xf32, #tpu.memory_space<vmem>>, vector<1x1x128xf32>
    %113 = vector.shape_cast %112 : vector<1x1x128xf32> to vector<1x128xf32>
    %114 = arith.addf %109, %113 : vector<1x128xf32>
    %c3_79 = arith.constant 3 : index
    %c2_80 = arith.constant 2 : index
    %115 = memref.load %arg0[%c3_79, %c2_80] : memref<8x5xi32, #tpu.memory_space<smem>>
    %116 = arith.index_cast %115 : i32 to index
    %c0_81 = arith.constant 0 : index
    %c0_82 = arith.constant 0 : index
    %117 = vector.load %arg6[%116, %c0_81, %c0_82] : memref<4x1x128xf32, #tpu.memory_space<vmem>>, vector<1x1x128xf32>
    %118 = vector.shape_cast %117 : vector<1x1x128xf32> to vector<1x128xf32>
    %119 = arith.addf %114, %118 : vector<1x128xf32>
    %c3_83 = arith.constant 3 : index
    %c3_84 = arith.constant 3 : index
    %120 = memref.load %arg0[%c3_83, %c3_84] : memref<8x5xi32, #tpu.memory_space<smem>>
    %121 = arith.index_cast %120 : i32 to index
    %c0_85 = arith.constant 0 : index
    %c0_86 = arith.constant 0 : index
    %122 = vector.load %arg7[%121, %c0_85, %c0_86] : memref<3x1x128xf32, #tpu.memory_space<vmem>>, vector<1x1x128xf32>
    %123 = vector.shape_cast %122 : vector<1x1x128xf32> to vector<1x128xf32>
    %124 = arith.addf %119, %123 : vector<1x128xf32>
    %c3_87 = arith.constant 3 : index
    %c4_88 = arith.constant 4 : index
    %125 = memref.load %arg0[%c3_87, %c4_88] : memref<8x5xi32, #tpu.memory_space<smem>>
    %126 = arith.index_cast %125 : i32 to index
    %c0_89 = arith.constant 0 : index
    %c0_90 = arith.constant 0 : index
    %127 = vector.load %arg8[%126, %c0_89, %c0_90] : memref<7x1x128xf32, #tpu.memory_space<vmem>>, vector<1x1x128xf32>
    %128 = vector.shape_cast %127 : vector<1x1x128xf32> to vector<1x128xf32>
    %129 = arith.addf %124, %128 : vector<1x128xf32>
    %c4_91 = arith.constant 4 : index
    %c0_92 = arith.constant 0 : index
    %130 = memref.load %arg1[%c4_91, %c0_92] : memref<8x1xf32, #tpu.memory_space<smem>>
    %131 = vector.broadcast %130 : f32 to vector<1x128xf32>
    %132 = arith.mulf %131, %11 : vector<1x128xf32>
    %133 = arith.addf %12, %132 : vector<1x128xf32>
    %c4_93 = arith.constant 4 : index
    %c0_94 = arith.constant 0 : index
    %134 = memref.load %arg0[%c4_93, %c0_94] : memref<8x5xi32, #tpu.memory_space<smem>>
    %135 = arith.index_cast %134 : i32 to index
    %c0_95 = arith.constant 0 : index
    %c0_96 = arith.constant 0 : index
    %136 = vector.load %arg4[%135, %c0_95, %c0_96] : memref<6x1x128xf32, #tpu.memory_space<vmem>>, vector<1x1x128xf32>
    %137 = vector.shape_cast %136 : vector<1x1x128xf32> to vector<1x128xf32>
    %138 = arith.addf %133, %137 : vector<1x128xf32>
    %c4_97 = arith.constant 4 : index
    %c1_98 = arith.constant 1 : index
    %139 = memref.load %arg0[%c4_97, %c1_98] : memref<8x5xi32, #tpu.memory_space<smem>>
    %140 = arith.index_cast %139 : i32 to index
    %c0_99 = arith.constant 0 : index
    %c0_100 = arith.constant 0 : index
    %141 = vector.load %arg5[%140, %c0_99, %c0_100] : memref<5x1x128xf32, #tpu.memory_space<vmem>>, vector<1x1x128xf32>
    %142 = vector.shape_cast %141 : vector<1x1x128xf32> to vector<1x128xf32>
    %143 = arith.addf %138, %142 : vector<1x128xf32>
    %c4_101 = arith.constant 4 : index
    %c2_102 = arith.constant 2 : index
    %144 = memref.load %arg0[%c4_101, %c2_102] : memref<8x5xi32, #tpu.memory_space<smem>>
    %145 = arith.index_cast %144 : i32 to index
    %c0_103 = arith.constant 0 : index
    %c0_104 = arith.constant 0 : index
    %146 = vector.load %arg6[%145, %c0_103, %c0_104] : memref<4x1x128xf32, #tpu.memory_space<vmem>>, vector<1x1x128xf32>
    %147 = vector.shape_cast %146 : vector<1x1x128xf32> to vector<1x128xf32>
    %148 = arith.addf %143, %147 : vector<1x128xf32>
    %c4_105 = arith.constant 4 : index
    %c3_106 = arith.constant 3 : index
    %149 = memref.load %arg0[%c4_105, %c3_106] : memref<8x5xi32, #tpu.memory_space<smem>>
    %150 = arith.index_cast %149 : i32 to index
    %c0_107 = arith.constant 0 : index
    %c0_108 = arith.constant 0 : index
    %151 = vector.load %arg7[%150, %c0_107, %c0_108] : memref<3x1x128xf32, #tpu.memory_space<vmem>>, vector<1x1x128xf32>
    %152 = vector.shape_cast %151 : vector<1x1x128xf32> to vector<1x128xf32>
    %153 = arith.addf %148, %152 : vector<1x128xf32>
    %c4_109 = arith.constant 4 : index
    %c4_110 = arith.constant 4 : index
    %154 = memref.load %arg0[%c4_109, %c4_110] : memref<8x5xi32, #tpu.memory_space<smem>>
    %155 = arith.index_cast %154 : i32 to index
    %c0_111 = arith.constant 0 : index
    %c0_112 = arith.constant 0 : index
    %156 = vector.load %arg8[%155, %c0_111, %c0_112] : memref<7x1x128xf32, #tpu.memory_space<vmem>>, vector<1x1x128xf32>
    %157 = vector.shape_cast %156 : vector<1x1x128xf32> to vector<1x128xf32>
    %158 = arith.addf %153, %157 : vector<1x128xf32>
    %c5 = arith.constant 5 : index
    %c0_113 = arith.constant 0 : index
    %159 = memref.load %arg1[%c5, %c0_113] : memref<8x1xf32, #tpu.memory_space<smem>>
    %160 = vector.broadcast %159 : f32 to vector<1x128xf32>
    %161 = arith.mulf %160, %11 : vector<1x128xf32>
    %162 = arith.addf %12, %161 : vector<1x128xf32>
    %c5_114 = arith.constant 5 : index
    %c0_115 = arith.constant 0 : index
    %163 = memref.load %arg0[%c5_114, %c0_115] : memref<8x5xi32, #tpu.memory_space<smem>>
    %164 = arith.index_cast %163 : i32 to index
    %c0_116 = arith.constant 0 : index
    %c0_117 = arith.constant 0 : index
    %165 = vector.load %arg4[%164, %c0_116, %c0_117] : memref<6x1x128xf32, #tpu.memory_space<vmem>>, vector<1x1x128xf32>
    %166 = vector.shape_cast %165 : vector<1x1x128xf32> to vector<1x128xf32>
    %167 = arith.addf %162, %166 : vector<1x128xf32>
    %c5_118 = arith.constant 5 : index
    %c1_119 = arith.constant 1 : index
    %168 = memref.load %arg0[%c5_118, %c1_119] : memref<8x5xi32, #tpu.memory_space<smem>>
    %169 = arith.index_cast %168 : i32 to index
    %c0_120 = arith.constant 0 : index
    %c0_121 = arith.constant 0 : index
    %170 = vector.load %arg5[%169, %c0_120, %c0_121] : memref<5x1x128xf32, #tpu.memory_space<vmem>>, vector<1x1x128xf32>
    %171 = vector.shape_cast %170 : vector<1x1x128xf32> to vector<1x128xf32>
    %172 = arith.addf %167, %171 : vector<1x128xf32>
    %c5_122 = arith.constant 5 : index
    %c2_123 = arith.constant 2 : index
    %173 = memref.load %arg0[%c5_122, %c2_123] : memref<8x5xi32, #tpu.memory_space<smem>>
    %174 = arith.index_cast %173 : i32 to index
    %c0_124 = arith.constant 0 : index
    %c0_125 = arith.constant 0 : index
    %175 = vector.load %arg6[%174, %c0_124, %c0_125] : memref<4x1x128xf32, #tpu.memory_space<vmem>>, vector<1x1x128xf32>
    %176 = vector.shape_cast %175 : vector<1x1x128xf32> to vector<1x128xf32>
    %177 = arith.addf %172, %176 : vector<1x128xf32>
    %c5_126 = arith.constant 5 : index
    %c3_127 = arith.constant 3 : index
    %178 = memref.load %arg0[%c5_126, %c3_127] : memref<8x5xi32, #tpu.memory_space<smem>>
    %179 = arith.index_cast %178 : i32 to index
    %c0_128 = arith.constant 0 : index
    %c0_129 = arith.constant 0 : index
    %180 = vector.load %arg7[%179, %c0_128, %c0_129] : memref<3x1x128xf32, #tpu.memory_space<vmem>>, vector<1x1x128xf32>
    %181 = vector.shape_cast %180 : vector<1x1x128xf32> to vector<1x128xf32>
    %182 = arith.addf %177, %181 : vector<1x128xf32>
    %c5_130 = arith.constant 5 : index
    %c4_131 = arith.constant 4 : index
    %183 = memref.load %arg0[%c5_130, %c4_131] : memref<8x5xi32, #tpu.memory_space<smem>>
    %184 = arith.index_cast %183 : i32 to index
    %c0_132 = arith.constant 0 : index
    %c0_133 = arith.constant 0 : index
    %185 = vector.load %arg8[%184, %c0_132, %c0_133] : memref<7x1x128xf32, #tpu.memory_space<vmem>>, vector<1x1x128xf32>
    %186 = vector.shape_cast %185 : vector<1x1x128xf32> to vector<1x128xf32>
    %187 = arith.addf %182, %186 : vector<1x128xf32>
    %c6 = arith.constant 6 : index
    %c0_134 = arith.constant 0 : index
    %188 = memref.load %arg1[%c6, %c0_134] : memref<8x1xf32, #tpu.memory_space<smem>>
    %189 = vector.broadcast %188 : f32 to vector<1x128xf32>
    %190 = arith.mulf %189, %11 : vector<1x128xf32>
    %191 = arith.addf %12, %190 : vector<1x128xf32>
    %c6_135 = arith.constant 6 : index
    %c0_136 = arith.constant 0 : index
    %192 = memref.load %arg0[%c6_135, %c0_136] : memref<8x5xi32, #tpu.memory_space<smem>>
    %193 = arith.index_cast %192 : i32 to index
    %c0_137 = arith.constant 0 : index
    %c0_138 = arith.constant 0 : index
    %194 = vector.load %arg4[%193, %c0_137, %c0_138] : memref<6x1x128xf32, #tpu.memory_space<vmem>>, vector<1x1x128xf32>
    %195 = vector.shape_cast %194 : vector<1x1x128xf32> to vector<1x128xf32>
    %196 = arith.addf %191, %195 : vector<1x128xf32>
    %c6_139 = arith.constant 6 : index
    %c1_140 = arith.constant 1 : index
    %197 = memref.load %arg0[%c6_139, %c1_140] : memref<8x5xi32, #tpu.memory_space<smem>>
    %198 = arith.index_cast %197 : i32 to index
    %c0_141 = arith.constant 0 : index
    %c0_142 = arith.constant 0 : index
    %199 = vector.load %arg5[%198, %c0_141, %c0_142] : memref<5x1x128xf32, #tpu.memory_space<vmem>>, vector<1x1x128xf32>
    %200 = vector.shape_cast %199 : vector<1x1x128xf32> to vector<1x128xf32>
    %201 = arith.addf %196, %200 : vector<1x128xf32>
    %c6_143 = arith.constant 6 : index
    %c2_144 = arith.constant 2 : index
    %202 = memref.load %arg0[%c6_143, %c2_144] : memref<8x5xi32, #tpu.memory_space<smem>>
    %203 = arith.index_cast %202 : i32 to index
    %c0_145 = arith.constant 0 : index
    %c0_146 = arith.constant 0 : index
    %204 = vector.load %arg6[%203, %c0_145, %c0_146] : memref<4x1x128xf32, #tpu.memory_space<vmem>>, vector<1x1x128xf32>
    %205 = vector.shape_cast %204 : vector<1x1x128xf32> to vector<1x128xf32>
    %206 = arith.addf %201, %205 : vector<1x128xf32>
    %c6_147 = arith.constant 6 : index
    %c3_148 = arith.constant 3 : index
    %207 = memref.load %arg0[%c6_147, %c3_148] : memref<8x5xi32, #tpu.memory_space<smem>>
    %208 = arith.index_cast %207 : i32 to index
    %c0_149 = arith.constant 0 : index
    %c0_150 = arith.constant 0 : index
    %209 = vector.load %arg7[%208, %c0_149, %c0_150] : memref<3x1x128xf32, #tpu.memory_space<vmem>>, vector<1x1x128xf32>
    %210 = vector.shape_cast %209 : vector<1x1x128xf32> to vector<1x128xf32>
    %211 = arith.addf %206, %210 : vector<1x128xf32>
    %c6_151 = arith.constant 6 : index
    %c4_152 = arith.constant 4 : index
    %212 = memref.load %arg0[%c6_151, %c4_152] : memref<8x5xi32, #tpu.memory_space<smem>>
    %213 = arith.index_cast %212 : i32 to index
    %c0_153 = arith.constant 0 : index
    %c0_154 = arith.constant 0 : index
    %214 = vector.load %arg8[%213, %c0_153, %c0_154] : memref<7x1x128xf32, #tpu.memory_space<vmem>>, vector<1x1x128xf32>
    %215 = vector.shape_cast %214 : vector<1x1x128xf32> to vector<1x128xf32>
    %216 = arith.addf %211, %215 : vector<1x128xf32>
    %c7 = arith.constant 7 : index
    %c0_155 = arith.constant 0 : index
    %217 = memref.load %arg1[%c7, %c0_155] : memref<8x1xf32, #tpu.memory_space<smem>>
    %218 = vector.broadcast %217 : f32 to vector<1x128xf32>
    %219 = arith.mulf %218, %11 : vector<1x128xf32>
    %220 = arith.addf %12, %219 : vector<1x128xf32>
    %c7_156 = arith.constant 7 : index
    %c0_157 = arith.constant 0 : index
    %221 = memref.load %arg0[%c7_156, %c0_157] : memref<8x5xi32, #tpu.memory_space<smem>>
    %222 = arith.index_cast %221 : i32 to index
    %c0_158 = arith.constant 0 : index
    %c0_159 = arith.constant 0 : index
    %223 = vector.load %arg4[%222, %c0_158, %c0_159] : memref<6x1x128xf32, #tpu.memory_space<vmem>>, vector<1x1x128xf32>
    %224 = vector.shape_cast %223 : vector<1x1x128xf32> to vector<1x128xf32>
    %225 = arith.addf %220, %224 : vector<1x128xf32>
    %c7_160 = arith.constant 7 : index
    %c1_161 = arith.constant 1 : index
    %226 = memref.load %arg0[%c7_160, %c1_161] : memref<8x5xi32, #tpu.memory_space<smem>>
    %227 = arith.index_cast %226 : i32 to index
    %c0_162 = arith.constant 0 : index
    %c0_163 = arith.constant 0 : index
    %228 = vector.load %arg5[%227, %c0_162, %c0_163] : memref<5x1x128xf32, #tpu.memory_space<vmem>>, vector<1x1x128xf32>
    %229 = vector.shape_cast %228 : vector<1x1x128xf32> to vector<1x128xf32>
    %230 = arith.addf %225, %229 : vector<1x128xf32>
    %c7_164 = arith.constant 7 : index
    %c2_165 = arith.constant 2 : index
    %231 = memref.load %arg0[%c7_164, %c2_165] : memref<8x5xi32, #tpu.memory_space<smem>>
    %232 = arith.index_cast %231 : i32 to index
    %c0_166 = arith.constant 0 : index
    %c0_167 = arith.constant 0 : index
    %233 = vector.load %arg6[%232, %c0_166, %c0_167] : memref<4x1x128xf32, #tpu.memory_space<vmem>>, vector<1x1x128xf32>
    %234 = vector.shape_cast %233 : vector<1x1x128xf32> to vector<1x128xf32>
    %235 = arith.addf %230, %234 : vector<1x128xf32>
    %c7_168 = arith.constant 7 : index
    %c3_169 = arith.constant 3 : index
    %236 = memref.load %arg0[%c7_168, %c3_169] : memref<8x5xi32, #tpu.memory_space<smem>>
    %237 = arith.index_cast %236 : i32 to index
    %c0_170 = arith.constant 0 : index
    %c0_171 = arith.constant 0 : index
    %238 = vector.load %arg7[%237, %c0_170, %c0_171] : memref<3x1x128xf32, #tpu.memory_space<vmem>>, vector<1x1x128xf32>
    %239 = vector.shape_cast %238 : vector<1x1x128xf32> to vector<1x128xf32>
    %240 = arith.addf %235, %239 : vector<1x128xf32>
    %c7_172 = arith.constant 7 : index
    %c4_173 = arith.constant 4 : index
    %241 = memref.load %arg0[%c7_172, %c4_173] : memref<8x5xi32, #tpu.memory_space<smem>>
    %242 = arith.index_cast %241 : i32 to index
    %c0_174 = arith.constant 0 : index
    %c0_175 = arith.constant 0 : index
    %243 = vector.load %arg8[%242, %c0_174, %c0_175] : memref<7x1x128xf32, #tpu.memory_space<vmem>>, vector<1x1x128xf32>
    %244 = vector.shape_cast %243 : vector<1x1x128xf32> to vector<1x128xf32>
    %245 = arith.addf %240, %244 : vector<1x128xf32>
    %cst_176 = arith.constant 0.000000e+00 : f32
    %246 = vector.broadcast %cst_176 : f32 to vector<1x32xf32>
    %cst_177 = arith.constant 0.000000e+00 : f32
    %247 = vector.broadcast %cst_177 : f32 to vector<1x32xf32>
    %248 = arith.truncf %246 : vector<1x32xf32> to vector<1x32xbf16>
    %cst_178 = arith.constant dense<0.000000e+00> : vector<1x128xf32>
    %249 = tpu.matmul %248, %13, %cst_178 {dimension_numbers = #tpu.dot_dimension_numbers<[1], [0], [0], [1], [0, 0, 1, 1], [], []>} : vector<1x32xbf16>, vector<32x128xbf16>, vector<1x128xf32> -> vector<1x128xf32>
    %250 = arith.addf %42, %249 : vector<1x128xf32>
    %251 = arith.mulf %250, %8 : vector<1x128xf32>
    %252 = math.tanh %251 : vector<1x128xf32>
    %253 = arith.mulf %8, %252 : vector<1x128xf32>
    %254 = arith.addf %253, %10 : vector<1x128xf32>
    %255 = vector.extract_strided_slice %254 {offsets = [0, 0], sizes = [1, 32], strides = [1, 1]} : vector<1x128xf32> to vector<1x32xf32>
    %256 = vector.extract_strided_slice %254 {offsets = [0, 32], sizes = [1, 32], strides = [1, 1]} : vector<1x128xf32> to vector<1x32xf32>
    %257 = vector.extract_strided_slice %254 {offsets = [0, 64], sizes = [1, 32], strides = [1, 1]} : vector<1x128xf32> to vector<1x32xf32>
    %258 = vector.extract_strided_slice %254 {offsets = [0, 96], sizes = [1, 32], strides = [1, 1]} : vector<1x128xf32> to vector<1x32xf32>
    %259 = arith.mulf %256, %247 : vector<1x32xf32>
    %260 = arith.mulf %255, %257 : vector<1x32xf32>
    %261 = arith.addf %259, %260 : vector<1x32xf32>
    %262 = math.tanh %261 : vector<1x32xf32>
    %263 = arith.mulf %258, %262 : vector<1x32xf32>
    %c0_179 = arith.constant 0 : index
    %c0_180 = arith.constant 0 : index
    %264 = vector.load %arg13[%c0_179, %c0_180] : memref<8x32xf32, #tpu.memory_space<vmem>>, vector<1x32xf32>
    tpu.vector_store %arg13[%c0_179, %c0_180], %263 {strides = array<i32>} : memref<8x32xf32, #tpu.memory_space<vmem>>, vector<1x32xf32>,
    %265 = arith.truncf %263 : vector<1x32xf32> to vector<1x32xbf16>
    %cst_181 = arith.constant dense<0.000000e+00> : vector<1x128xf32>
    %266 = tpu.matmul %265, %13, %cst_181 {dimension_numbers = #tpu.dot_dimension_numbers<[1], [0], [0], [1], [0, 0, 1, 1], [], []>} : vector<1x32xbf16>, vector<32x128xbf16>, vector<1x128xf32> -> vector<1x128xf32>
    %267 = arith.addf %71, %266 : vector<1x128xf32>
    %268 = arith.mulf %267, %8 : vector<1x128xf32>
    %269 = math.tanh %268 : vector<1x128xf32>
    %270 = arith.mulf %8, %269 : vector<1x128xf32>
    %271 = arith.addf %270, %10 : vector<1x128xf32>
    %272 = vector.extract_strided_slice %271 {offsets = [0, 0], sizes = [1, 32], strides = [1, 1]} : vector<1x128xf32> to vector<1x32xf32>
    %273 = vector.extract_strided_slice %271 {offsets = [0, 32], sizes = [1, 32], strides = [1, 1]} : vector<1x128xf32> to vector<1x32xf32>
    %274 = vector.extract_strided_slice %271 {offsets = [0, 64], sizes = [1, 32], strides = [1, 1]} : vector<1x128xf32> to vector<1x32xf32>
    %275 = vector.extract_strided_slice %271 {offsets = [0, 96], sizes = [1, 32], strides = [1, 1]} : vector<1x128xf32> to vector<1x32xf32>
    %276 = arith.mulf %273, %261 : vector<1x32xf32>
    %277 = arith.mulf %272, %274 : vector<1x32xf32>
    %278 = arith.addf %276, %277 : vector<1x32xf32>
    %279 = math.tanh %278 : vector<1x32xf32>
    %280 = arith.mulf %275, %279 : vector<1x32xf32>
    %c1_182 = arith.constant 1 : index
    %c0_183 = arith.constant 0 : index
    %281 = vector.load %arg13[%c1_182, %c0_183] : memref<8x32xf32, #tpu.memory_space<vmem>>, vector<1x32xf32>
    tpu.vector_store %arg13[%c1_182, %c0_183], %280 {strides = array<i32>} : memref<8x32xf32, #tpu.memory_space<vmem>>, vector<1x32xf32>,
    %282 = arith.truncf %280 : vector<1x32xf32> to vector<1x32xbf16>
    %cst_184 = arith.constant dense<0.000000e+00> : vector<1x128xf32>
    %283 = tpu.matmul %282, %13, %cst_184 {dimension_numbers = #tpu.dot_dimension_numbers<[1], [0], [0], [1], [0, 0, 1, 1], [], []>} : vector<1x32xbf16>, vector<32x128xbf16>, vector<1x128xf32> -> vector<1x128xf32>
    %284 = arith.addf %100, %283 : vector<1x128xf32>
    %285 = arith.mulf %284, %8 : vector<1x128xf32>
    %286 = math.tanh %285 : vector<1x128xf32>
    %287 = arith.mulf %8, %286 : vector<1x128xf32>
    %288 = arith.addf %287, %10 : vector<1x128xf32>
    %289 = vector.extract_strided_slice %288 {offsets = [0, 0], sizes = [1, 32], strides = [1, 1]} : vector<1x128xf32> to vector<1x32xf32>
    %290 = vector.extract_strided_slice %288 {offsets = [0, 32], sizes = [1, 32], strides = [1, 1]} : vector<1x128xf32> to vector<1x32xf32>
    %291 = vector.extract_strided_slice %288 {offsets = [0, 64], sizes = [1, 32], strides = [1, 1]} : vector<1x128xf32> to vector<1x32xf32>
    %292 = vector.extract_strided_slice %288 {offsets = [0, 96], sizes = [1, 32], strides = [1, 1]} : vector<1x128xf32> to vector<1x32xf32>
    %293 = arith.mulf %290, %278 : vector<1x32xf32>
    %294 = arith.mulf %289, %291 : vector<1x32xf32>
    %295 = arith.addf %293, %294 : vector<1x32xf32>
    %296 = math.tanh %295 : vector<1x32xf32>
    %297 = arith.mulf %292, %296 : vector<1x32xf32>
    %c2_185 = arith.constant 2 : index
    %c0_186 = arith.constant 0 : index
    %298 = vector.load %arg13[%c2_185, %c0_186] : memref<8x32xf32, #tpu.memory_space<vmem>>, vector<1x32xf32>
    tpu.vector_store %arg13[%c2_185, %c0_186], %297 {strides = array<i32>} : memref<8x32xf32, #tpu.memory_space<vmem>>, vector<1x32xf32>,
    %299 = arith.truncf %297 : vector<1x32xf32> to vector<1x32xbf16>
    %cst_187 = arith.constant dense<0.000000e+00> : vector<1x128xf32>
    %300 = tpu.matmul %299, %13, %cst_187 {dimension_numbers = #tpu.dot_dimension_numbers<[1], [0], [0], [1], [0, 0, 1, 1], [], []>} : vector<1x32xbf16>, vector<32x128xbf16>, vector<1x128xf32> -> vector<1x128xf32>
    %301 = arith.addf %129, %300 : vector<1x128xf32>
    %302 = arith.mulf %301, %8 : vector<1x128xf32>
    %303 = math.tanh %302 : vector<1x128xf32>
    %304 = arith.mulf %8, %303 : vector<1x128xf32>
    %305 = arith.addf %304, %10 : vector<1x128xf32>
    %306 = vector.extract_strided_slice %305 {offsets = [0, 0], sizes = [1, 32], strides = [1, 1]} : vector<1x128xf32> to vector<1x32xf32>
    %307 = vector.extract_strided_slice %305 {offsets = [0, 32], sizes = [1, 32], strides = [1, 1]} : vector<1x128xf32> to vector<1x32xf32>
    %308 = vector.extract_strided_slice %305 {offsets = [0, 64], sizes = [1, 32], strides = [1, 1]} : vector<1x128xf32> to vector<1x32xf32>
    %309 = vector.extract_strided_slice %305 {offsets = [0, 96], sizes = [1, 32], strides = [1, 1]} : vector<1x128xf32> to vector<1x32xf32>
    %310 = arith.mulf %307, %295 : vector<1x32xf32>
    %311 = arith.mulf %306, %308 : vector<1x32xf32>
    %312 = arith.addf %310, %311 : vector<1x32xf32>
    %313 = math.tanh %312 : vector<1x32xf32>
    %314 = arith.mulf %309, %313 : vector<1x32xf32>
    %c3_188 = arith.constant 3 : index
    %c0_189 = arith.constant 0 : index
    %315 = vector.load %arg13[%c3_188, %c0_189] : memref<8x32xf32, #tpu.memory_space<vmem>>, vector<1x32xf32>
    tpu.vector_store %arg13[%c3_188, %c0_189], %314 {strides = array<i32>} : memref<8x32xf32, #tpu.memory_space<vmem>>, vector<1x32xf32>,
    %316 = arith.truncf %314 : vector<1x32xf32> to vector<1x32xbf16>
    %cst_190 = arith.constant dense<0.000000e+00> : vector<1x128xf32>
    %317 = tpu.matmul %316, %13, %cst_190 {dimension_numbers = #tpu.dot_dimension_numbers<[1], [0], [0], [1], [0, 0, 1, 1], [], []>} : vector<1x32xbf16>, vector<32x128xbf16>, vector<1x128xf32> -> vector<1x128xf32>
    %318 = arith.addf %158, %317 : vector<1x128xf32>
    %319 = arith.mulf %318, %8 : vector<1x128xf32>
    %320 = math.tanh %319 : vector<1x128xf32>
    %321 = arith.mulf %8, %320 : vector<1x128xf32>
    %322 = arith.addf %321, %10 : vector<1x128xf32>
    %323 = vector.extract_strided_slice %322 {offsets = [0, 0], sizes = [1, 32], strides = [1, 1]} : vector<1x128xf32> to vector<1x32xf32>
    %324 = vector.extract_strided_slice %322 {offsets = [0, 32], sizes = [1, 32], strides = [1, 1]} : vector<1x128xf32> to vector<1x32xf32>
    %325 = vector.extract_strided_slice %322 {offsets = [0, 64], sizes = [1, 32], strides = [1, 1]} : vector<1x128xf32> to vector<1x32xf32>
    %326 = vector.extract_strided_slice %322 {offsets = [0, 96], sizes = [1, 32], strides = [1, 1]} : vector<1x128xf32> to vector<1x32xf32>
    %327 = arith.mulf %324, %312 : vector<1x32xf32>
    %328 = arith.mulf %323, %325 : vector<1x32xf32>
    %329 = arith.addf %327, %328 : vector<1x32xf32>
    %330 = math.tanh %329 : vector<1x32xf32>
    %331 = arith.mulf %326, %330 : vector<1x32xf32>
    %c4_191 = arith.constant 4 : index
    %c0_192 = arith.constant 0 : index
    %332 = vector.load %arg13[%c4_191, %c0_192] : memref<8x32xf32, #tpu.memory_space<vmem>>, vector<1x32xf32>
    tpu.vector_store %arg13[%c4_191, %c0_192], %331 {strides = array<i32>} : memref<8x32xf32, #tpu.memory_space<vmem>>, vector<1x32xf32>,
    %333 = arith.truncf %331 : vector<1x32xf32> to vector<1x32xbf16>
    %cst_193 = arith.constant dense<0.000000e+00> : vector<1x128xf32>
    %334 = tpu.matmul %333, %13, %cst_193 {dimension_numbers = #tpu.dot_dimension_numbers<[1], [0], [0], [1], [0, 0, 1, 1], [], []>} : vector<1x32xbf16>, vector<32x128xbf16>, vector<1x128xf32> -> vector<1x128xf32>
    %335 = arith.addf %187, %334 : vector<1x128xf32>
    %336 = arith.mulf %335, %8 : vector<1x128xf32>
    %337 = math.tanh %336 : vector<1x128xf32>
    %338 = arith.mulf %8, %337 : vector<1x128xf32>
    %339 = arith.addf %338, %10 : vector<1x128xf32>
    %340 = vector.extract_strided_slice %339 {offsets = [0, 0], sizes = [1, 32], strides = [1, 1]} : vector<1x128xf32> to vector<1x32xf32>
    %341 = vector.extract_strided_slice %339 {offsets = [0, 32], sizes = [1, 32], strides = [1, 1]} : vector<1x128xf32> to vector<1x32xf32>
    %342 = vector.extract_strided_slice %339 {offsets = [0, 64], sizes = [1, 32], strides = [1, 1]} : vector<1x128xf32> to vector<1x32xf32>
    %343 = vector.extract_strided_slice %339 {offsets = [0, 96], sizes = [1, 32], strides = [1, 1]} : vector<1x128xf32> to vector<1x32xf32>
    %344 = arith.mulf %341, %329 : vector<1x32xf32>
    %345 = arith.mulf %340, %342 : vector<1x32xf32>
    %346 = arith.addf %344, %345 : vector<1x32xf32>
    %347 = math.tanh %346 : vector<1x32xf32>
    %348 = arith.mulf %343, %347 : vector<1x32xf32>
    %c5_194 = arith.constant 5 : index
    %c0_195 = arith.constant 0 : index
    %349 = vector.load %arg13[%c5_194, %c0_195] : memref<8x32xf32, #tpu.memory_space<vmem>>, vector<1x32xf32>
    tpu.vector_store %arg13[%c5_194, %c0_195], %348 {strides = array<i32>} : memref<8x32xf32, #tpu.memory_space<vmem>>, vector<1x32xf32>,
    %350 = arith.truncf %348 : vector<1x32xf32> to vector<1x32xbf16>
    %cst_196 = arith.constant dense<0.000000e+00> : vector<1x128xf32>
    %351 = tpu.matmul %350, %13, %cst_196 {dimension_numbers = #tpu.dot_dimension_numbers<[1], [0], [0], [1], [0, 0, 1, 1], [], []>} : vector<1x32xbf16>, vector<32x128xbf16>, vector<1x128xf32> -> vector<1x128xf32>
    %352 = arith.addf %216, %351 : vector<1x128xf32>
    %353 = arith.mulf %352, %8 : vector<1x128xf32>
    %354 = math.tanh %353 : vector<1x128xf32>
    %355 = arith.mulf %8, %354 : vector<1x128xf32>
    %356 = arith.addf %355, %10 : vector<1x128xf32>
    %357 = vector.extract_strided_slice %356 {offsets = [0, 0], sizes = [1, 32], strides = [1, 1]} : vector<1x128xf32> to vector<1x32xf32>
    %358 = vector.extract_strided_slice %356 {offsets = [0, 32], sizes = [1, 32], strides = [1, 1]} : vector<1x128xf32> to vector<1x32xf32>
    %359 = vector.extract_strided_slice %356 {offsets = [0, 64], sizes = [1, 32], strides = [1, 1]} : vector<1x128xf32> to vector<1x32xf32>
    %360 = vector.extract_strided_slice %356 {offsets = [0, 96], sizes = [1, 32], strides = [1, 1]} : vector<1x128xf32> to vector<1x32xf32>
    %361 = arith.mulf %358, %346 : vector<1x32xf32>
    %362 = arith.mulf %357, %359 : vector<1x32xf32>
    %363 = arith.addf %361, %362 : vector<1x32xf32>
    %364 = math.tanh %363 : vector<1x32xf32>
    %365 = arith.mulf %360, %364 : vector<1x32xf32>
    %c6_197 = arith.constant 6 : index
    %c0_198 = arith.constant 0 : index
    %366 = vector.load %arg13[%c6_197, %c0_198] : memref<8x32xf32, #tpu.memory_space<vmem>>, vector<1x32xf32>
    tpu.vector_store %arg13[%c6_197, %c0_198], %365 {strides = array<i32>} : memref<8x32xf32, #tpu.memory_space<vmem>>, vector<1x32xf32>,
    %367 = arith.truncf %365 : vector<1x32xf32> to vector<1x32xbf16>
    %cst_199 = arith.constant dense<0.000000e+00> : vector<1x128xf32>
    %368 = tpu.matmul %367, %13, %cst_199 {dimension_numbers = #tpu.dot_dimension_numbers<[1], [0], [0], [1], [0, 0, 1, 1], [], []>} : vector<1x32xbf16>, vector<32x128xbf16>, vector<1x128xf32> -> vector<1x128xf32>
    %369 = arith.addf %245, %368 : vector<1x128xf32>
    %370 = arith.mulf %369, %8 : vector<1x128xf32>
    %371 = math.tanh %370 : vector<1x128xf32>
    %372 = arith.mulf %8, %371 : vector<1x128xf32>
    %373 = arith.addf %372, %10 : vector<1x128xf32>
    %374 = vector.extract_strided_slice %373 {offsets = [0, 0], sizes = [1, 32], strides = [1, 1]} : vector<1x128xf32> to vector<1x32xf32>
    %375 = vector.extract_strided_slice %373 {offsets = [0, 32], sizes = [1, 32], strides = [1, 1]} : vector<1x128xf32> to vector<1x32xf32>
    %376 = vector.extract_strided_slice %373 {offsets = [0, 64], sizes = [1, 32], strides = [1, 1]} : vector<1x128xf32> to vector<1x32xf32>
    %377 = vector.extract_strided_slice %373 {offsets = [0, 96], sizes = [1, 32], strides = [1, 1]} : vector<1x128xf32> to vector<1x32xf32>
    %378 = arith.mulf %375, %363 : vector<1x32xf32>
    %379 = arith.mulf %374, %376 : vector<1x32xf32>
    %380 = arith.addf %378, %379 : vector<1x32xf32>
    %381 = math.tanh %380 : vector<1x32xf32>
    %382 = arith.mulf %377, %381 : vector<1x32xf32>
    %c7_200 = arith.constant 7 : index
    %c0_201 = arith.constant 0 : index
    %383 = vector.load %arg13[%c7_200, %c0_201] : memref<8x32xf32, #tpu.memory_space<vmem>>, vector<1x32xf32>
    tpu.vector_store %arg13[%c7_200, %c0_201], %382 {strides = array<i32>} : memref<8x32xf32, #tpu.memory_space<vmem>>, vector<1x32xf32>,
    %c0_202 = arith.constant 0 : index
    %c0_203 = arith.constant 0 : index
    %384 = vector.load %arg13[%c0_202, %c0_203] : memref<8x32xf32, #tpu.memory_space<vmem>>, vector<8x32xf32>
    %385 = arith.truncf %384 : vector<8x32xf32> to vector<8x32xbf16>
    %c0_204 = arith.constant 0 : index
    %c0_205 = arith.constant 0 : index
    %386 = vector.load %arg10[%c0_204, %c0_205] : memref<32x8xbf16, #tpu.memory_space<vmem>>, vector<32x8xbf16>
    %cst_206 = arith.constant dense<0.000000e+00> : vector<8x8xf32>
    %387 = tpu.matmul %385, %386, %cst_206 {dimension_numbers = #tpu.dot_dimension_numbers<[1], [0], [0], [1], [0, 0, 1, 1], [], []>} : vector<8x32xbf16>, vector<32x8xbf16>, vector<8x8xf32> -> vector<8x8xf32>
    %c0_207 = arith.constant 0 : index
    %c0_208 = arith.constant 0 : index
    %388 = vector.load %arg11[%c0_207, %c0_208] : memref<1x8xf32, #tpu.memory_space<vmem>>, vector<1x8xf32>
    %389 = vector.broadcast %388 : vector<1x8xf32> to vector<8x8xf32>
    %390 = arith.addf %387, %389 : vector<8x8xf32>
    %c0_209 = arith.constant 0 : index
    %c0_210 = arith.constant 0 : index
    %391 = vector.load %arg12[%c0_209, %c0_210] : memref<8x8xf32, #tpu.memory_space<vmem>>, vector<8x8xf32>
    tpu.vector_store %arg12[%c0_209, %c0_210], %390 {strides = array<i32>} : memref<8x8xf32, #tpu.memory_space<vmem>>, vector<8x8xf32>,
    return
  }
}

</mosaic_0001>

<bundles_post_ra>
// kernel: lstm_tagger_forward.1
= control target key start
LH: loop header
LB: loop body
LE: loop exit
PB: predicated region body
PF: predicated region fallthrough
CT: control target
= control target key end

     0   :  { %17 = vsyncpa [#allocation5], 0  ;;  %s1668_s0 = inlined_call_operand.vmem [shape: s32[8,5], index: 0, kind: input, shape index: {}]   ;;  %s1669_s1 = inlined_call_operand.vmem [shape: f32[8,1], index: 1, kind: input, shape index: {}]   ;;  %s1670_s2 = inlined_call_operand.vmem [shape: f32[1,128], index: 2, kind: input, shape index: {}]   ;;  %s1671_s3 = inlined_call_operand.vmem [shape: f32[1,128], index: 3, kind: input, shape index: {}]   ;;  %s1672_s4 = inlined_call_operand.vmem [shape: f32[6,1,128], index: 4, kind: input, shape index: {}]   ;;  %s1673_s5 = inlined_call_operand.vmem [shape: f32[5,1,128], index: 5, kind: input, shape index: {}]   ;;  %s1674_s6 = inlined_call_operand.vmem [shape: f32[4,1,128], index: 6, kind: input, shape index: {}]   ;;  %s1675_s7 = inlined_call_operand.vmem [shape: f32[3,1,128], index: 7, kind: input, shape index: {}]   ;;  %s1676_s8 = inlined_call_operand.vmem [shape: f32[7,1,128], index: 8, kind: input, shape index: {}]   ;;  %s1677_s9 = inlined_call_operand.vmem [shape: bf16[32,128], index: 9, kind: input, shape index: {}]   ;;  %s1678_s10 = inlined_call_operand.vmem [shape: bf16[32,8], index: 10, kind: input, shape index: {}]   ;;  %s1679_s11 = inlined_call_operand.vmem [shape: f32[1,8], index: 11, kind: input, shape index: {}]   ;;  %s1680_s12 = inlined_call_operand.hbm [shape: f32[8,8], index: 12, kind: output, shape index: {}]  }
   0x1   :  { %18 = vsyncpa [#allocation7], 0 }
   0x2   :  { %19 = vsyncpa [#allocation4], 0  ;;  %s26_s23 = sshll.u32 %s1668_s0, 4  ;;  %s36_s26 = sshll.u32 %s1669_s1, 4  ;;  %s27_s23 = int_to_ptr.vmem [resolvable:$true] %s26_s23  ;;  %s37_s26 = int_to_ptr.vmem [resolvable:$true] %s36_s26 }
   0x3   :  { %s1204_s27 = scalar_lea.vmem %s27_s23, 128  ;;  %p1209_p1 = scmp.lt.s32.totalorder %s27_s23, %s27_s23 }
   0x4   :  { %p1205_p0 = scmp.ne.s32.totalorder %s27_s23, %s1204_s27  ;;  %p1210_p2 = scmp.lt.s32.totalorder %s1204_s27, %s1204_s27 }
   0x6   :  { %p1211_p3 = por %p1210_p2, %p1209_p1 }
   0x8   :  { %p1212_p4 = pnand %p1211_p3, %p1205_p0 }
   0xa   :  { %1215 = shalt.err (!%p1212_p4)
}
   0xb   :  { %s1254_s28 = smov [#allocation3]   ;;  %s1216_s29 = scalar_lea.vmem %s37_s26, 128 }
   0xc   :  { %29 = dma.vmem_to_smem %s27_s23, 128, %s1254_s28, [#allocation5]  }
   0xd   :  { %p1217_p5 = scmp.ne.s32.totalorder %s37_s26, %s1216_s29  ;;  %p1221_p6 = scmp.lt.s32.totalorder %s37_s26, %s37_s26 }
   0xe   :  { %p1222_p7 = scmp.lt.s32.totalorder %s1216_s29, %s1216_s29 }
  0x10   :  { %p1223_p8 = por %p1222_p7, %p1221_p6 }
  0x12   :  { %p1224_p9 = pnand %p1223_p8, %p1217_p5 }
  0x14   :  { %1227 = shalt.err (!%p1224_p9)
}
  0x15   :  { %s1255_s0 = smov [#allocation6]  }
  0x16   :  { %39 = dma.vmem_to_smem %s37_s26, 128, %s1255_s0, [#allocation7]  }
  0x17   :  { %1248 = dma.done.wait [#allocation5], 128  }
  0x18   :  { %1249 = vsyncadd [#allocation5], 4294967168 }
  0x19   :  { %1250 = dma.done.wait [#allocation7], 128  }
  0x1a   :  { %1251 = vsyncadd [#allocation7], 4294967168 }
  0x1b   :  { %66 = sfence }
  0x1c   :  { %v1337_v0 = vld [vmem:[%s1677_s9 + $0x8] sm:$0xff]   ;;  %v1256_v1 = vmov 0.0   ;;  %v1345_v2 = vld [vmem:[%s1677_s9] sm:$0xff]   ;;  %vm1257_vm0 = vmmov 0   ;;  %v1258_v3 = vmov 0   ;;  %s81_s9 = sld [smem:[#allocation6]]  ;;  %v68_v13 = vlaneseq }
  0x1d   :  { %1087 = vmatprep.subr.bf16.mxu0 %v1256_v1  ;;  %1095 = vmatprep.subr.bf16.mxu1 %v1256_v1  ;;  %s85_s15 = sld [smem:[#allocation3]]  ;;  %v1367_v4 = vld [vmem:[%s1670_s2] sm:$0x1]  ;;  %v1259_v21 = vmov 0.5   ;;  %s1260_s16 = smov 64   ;;  %vm285_vm4 = vcmask 261120  }
  0x1e   :  { %1088 = vmatpush3.bf16.msra.mxu0 %v1337_v0  ;;  %1091 = vmatprep.mubr.msk.bf16.mxu0 %vm1257_vm0, %v1256_v1  ;;  %s1001_s18 = sld [smem:[#allocation3 + $0x1]]  ;;  %v1373_v7 = vld [vmem:[%s1671_s3] sm:$0x1]  ;;  %v69_v16 = vand.u32 127, %v68_v13  ;;  %s1261_s17 = smov 32   ;;  %vm355_vm5 = vcmask 253952  }
  0x1f   :  { %1089 = vmatprep.subr.bf16.mxu0 %v1256_v1  ;;  %1096 = vmatpush3.bf16.msra.mxu1 %v1337_v0  ;;  %s1002_s24 = sld [smem:[#allocation3 + $0x2]]  ;;  %vm943_vm6 = vcmask 64512  }
  0x20   :  { %1097 = vmatprep.subr.bf16.mxu1 %v1256_v1  ;;  %1099 = vmatprep.mubr.msk.bf16.mxu1 %vm1257_vm0, %v1256_v1  ;;  %s1003_s27 = sld [smem:[#allocation3 + $0x3]]  ;;  %vm70_vm1 = vcmp.ge.s32.totalorder %v69_v16, 64  ;;  %vm71_vm2 = vcmp.lt.s32.totalorder %v69_v16, 96 }
  0x21   :  { %s1004_s0 = sld [smem:[#allocation3 + $0x4]]  ;;  %vm72_vm3 = vmand %vm70_vm1, %vm71_vm2 }
  0x22   :  { %1090 = vmatpush3.bf16.msra.mxu0 %v1345_v2  ;;  %v82_v5 = vstv %s81_s9  ;;  %v1391_v22 = vsel %vm72_vm3, 1.0, %v1259_v21  ;;  %s1006_s19 = sld [smem:[#allocation3 + $0x80]] }
  0x23   :  { %1098 = vmatpush3.bf16.msra.mxu1 %v1345_v2  ;;  %1103 = vmatprep.subr.bf16.mxu0 %v1256_v1  ;;  %v83_v6 = vmul.f32 %v82_v5, %v1367_v4  ;;  %s86_s23 = scalar_lea.vmem %s1672_s4, %s85_s15  ;;  %v1395_v29 = vsub.f32 1.0, %v1391_v22  ;;  %s1007_s20 = sld [smem:[#allocation3 + $0x81]] }
  0x24   :  { %1111 = vmatprep.subr.bf16.mxu1 %v1256_v1  ;;  %v87_v9 = vld [vmem:[%s86_s23] sm:$0x1]  ;;  %s90_s26 = scalar_lea.vmem %s1673_s5, %s1001_s18  ;;  %s1005_s18 = sld [smem:[#allocation6 + $0x80]] }
  0x25   :  { %1092 = vmatmul.mubr.bf16.vlgmr.msra.gmra.mxu0 %v1258_v3  ;;  %v84_v8 = vadd.f32 %v83_v6, %v1373_v7  ;;  %v91_v11 = vld [vmem:[%s90_s26] sm:$0x1]  ;;  %s94_s3 = scalar_lea.vmem %s1674_s6, %s1002_s24  ;;  %s1008_s24 = sld [smem:[#allocation3 + $0x82]] }
  0x26   :  { %1104 = vmatpush3.bf16.msra.mxu0 %v1337_v0  ;;  %1107 = vmatprep.mubr.msk.bf16.mxu0 %vm1257_vm0, %v1256_v1  ;;  %v95_v14 = vld [vmem:[%s94_s3] sm:$0x1]  ;;  %s98_s13 = scalar_lea.vmem %s1675_s7, %s1003_s27  ;;  %s1009_s27 = sld [smem:[#allocation3 + $0x83]] }
  0x27   :  { %1105 = vmatprep.subr.bf16.mxu0 %v1256_v1  ;;  %v88_v10 = vadd.f32 %v87_v9, %v84_v8  ;;  %v99_v17 = vld [vmem:[%s98_s13] sm:$0x1]  ;;  %s102_s15 = scalar_lea.vmem %s1676_s8, %s1004_s0  ;;  %s1010_s0 = sld [smem:[#allocation3 + $0x84]] }
  0x28   :  { %v103_v19 = vld [vmem:[%s102_s15] sm:$0x1]  ;;  %s110_s23 = scalar_lea.vmem %s1672_s4, %s1006_s19  ;;  %s1012_s19 = sld [smem:[#allocation3 + $0x100]] }
  0x29   :  { %v92_v12 = vadd.f32 %v91_v11, %v88_v10  ;;  %v111_v46 = vld [vmem:[%s110_s23] sm:$0x1]  ;;  %s114_s26 = scalar_lea.vmem %s1673_s5, %s1007_s20  ;;  %s1013_s20 = sld [smem:[#allocation3 + $0x101]] }
  0x2a   :  { %1106 = vmatpush3.bf16.msra.mxu0 %v1345_v2  ;;  %v106_v43 = vstv %s1005_s18  ;;  %v115_v48 = vld [vmem:[%s114_s26] sm:$0x1]  ;;  %s1011_s18 = sld [smem:[#allocation6 + $0x100]] }
  0x2b   :  { %1119 = vmatprep.subr.bf16.mxu0 %v1256_v1  ;;  %v96_v15 = vadd.f32 %v95_v14, %v92_v12  ;;  %v107_v44 = vmul.f32 %v106_v43, %v1367_v4  ;;  %s118_s3 = scalar_lea.vmem %s1674_s6, %s1008_s24  ;;  %s1014_s24 = sld [smem:[#allocation3 + $0x102]] }
  0x2c   :  { %v119_v50 = vld [vmem:[%s118_s3] sm:$0x1]  ;;  %s122_s13 = scalar_lea.vmem %s1675_s7, %s1009_s27  ;;  %s1015_s27 = sld [smem:[#allocation3 + $0x103]] }
  0x2d   :  { %v100_v18 = vadd.f32 %v99_v17, %v96_v15  ;;  %v108_v45 = vadd.f32 %v107_v44, %v1373_v7  ;;  %v123_v52 = vld [vmem:[%s122_s13] sm:$0x1]  ;;  %s126_s15 = scalar_lea.vmem %s1676_s8, %s1010_s0  ;;  %s1016_s0 = sld [smem:[#allocation3 + $0x104]] }
  0x2e   :  { %v127_v54 = vld [vmem:[%s126_s15] sm:$0x1]  ;;  %s134_s23 = scalar_lea.vmem %s1672_s4, %s1012_s19  ;;  %s1018_s19 = sld [smem:[#allocation3 + $0x180]] }
  0x2f   :  { %v104_v20 = vadd.f32 %v103_v19, %v100_v18  ;;  %v112_v47 = vadd.f32 %v111_v46, %v108_v45  ;;  %v135_v19 = vld [vmem:[%s134_s23] sm:$0x1]  ;;  %s138_s26 = scalar_lea.vmem %s1673_s5, %s1013_s20  ;;  %s1019_s20 = sld [smem:[#allocation3 + $0x181]] }
  0x30   :  { %v130_v16 = vstv %s1011_s18  ;;  %v139_v21 = vld [vmem:[%s138_s26] sm:$0x1]  ;;  %s1017_s18 = sld [smem:[#allocation6 + $0x180]] }
  0x31   :  { %v116_v49 = vadd.f32 %v115_v48, %v112_v47  ;;  %v131_v17 = vmul.f32 %v130_v16, %v1367_v4  ;;  %s142_s3 = scalar_lea.vmem %s1674_s6, %s1014_s24  ;;  %s1020_s24 = sld [smem:[#allocation3 + $0x182]] }
  0x32   :  { %s146_s13 = scalar_lea.vmem %s1675_s7, %s1015_s27  ;;  %s1021_s27 = sld [smem:[#allocation3 + $0x183]] }
  0x33   :  { %v120_v51 = vadd.f32 %v119_v50, %v116_v49  ;;  %v132_v18 = vadd.f32 %v131_v17, %v1373_v7  ;;  %s150_s15 = scalar_lea.vmem %s1676_s8, %s1016_s0  ;;  %s1022_s0 = sld [smem:[#allocation3 + $0x184]] }
  0x34   :  { %s158_s23 = scalar_lea.vmem %s1672_s4, %s1018_s19  ;;  %s1024_s19 = sld [smem:[#allocation3 + $0x200]] }
  0x35   :  { %v124_v53 = vadd.f32 %v123_v52, %v120_v51  ;;  %s162_s26 = scalar_lea.vmem %s1673_s5, %s1019_s20  ;;  %s1025_s20 = sld [smem:[#allocation3 + $0x201]] }
  0x36   :  { %v154_v51 = vstv %s1017_s18  ;;  %s1023_s18 = sld [smem:[#allocation6 + $0x200]] }
  0x37   :  { %v128_v55 = vadd.f32 %v127_v54, %v124_v53  ;;  %v155_v52 = vmul.f32 %v154_v51, %v1367_v4  ;;  %v159_v54 = vld [vmem:[%s158_s23] sm:$0x1] }
  0x39   :  { %v156_v53 = vadd.f32 %v155_v52, %v1373_v7 }
  0x3a   :  { %s182_s23 = scalar_lea.vmem %s1672_s4, %s1024_s19  ;;  %s1030_s19 = sld [smem:[#allocation3 + $0x280]] }
  0xe5   :  { %v323_v23 = vpop.f32.mrf.mxu0 }
  0xe6   :  { %v329_v24 = vadd.f32 %v323_v23, %v104_v20  ;;  %v136_v20 = vadd.f32 %v135_v19, %v132_v18 }
  0xe7   :  { %v1093_v25 = vpop.f32.mrf.mxu0 }
  0xe8   :  { %v330_v26 = vmul.f32 %v329_v24, %v1391_v22  ;;  %v140_v23 = vadd.f32 %v139_v21, %v136_v20  ;;  %v143_v24 = vld [vmem:[%s142_s3] sm:$0x1]  ;;  %s166_s3 = scalar_lea.vmem %s1674_s6, %s1020_s24  ;;  %s1026_s24 = sld [smem:[#allocation3 + $0x202]] }
  0xe9   :  { %v326_v27 = vpop.f32.mrf.mxu0 }
  0xea   :  { %1172 = vtanh.f32 %v330_v26  ;;  %v144_v25 = vadd.f32 %v143_v24, %v140_v23  ;;  %v147_v26 = vld [vmem:[%s146_s13] sm:$0x1]  ;;  %s170_s13 = scalar_lea.vmem %s1675_s7, %s1021_s27  ;;  %s1027_s27 = sld [smem:[#allocation3 + $0x203]] }
  0xeb   :  { %v1094_v28 = vpop.f32.mrf.mxu0 }
  0xec   :  { %v148_v27 = vadd.f32 %v147_v26, %v144_v25  ;;  %v151_v28 = vld [vmem:[%s150_s15] sm:$0x1]  ;;  %s174_s15 = scalar_lea.vmem %s1676_s8, %s1022_s0  ;;  %v178_v26 = vstv %s1023_s18  ;;  %s1028_s0 = sld [smem:[#allocation3 + $0x204]] }
  0xed   :  { %s1029_s18 = sld [smem:[#allocation6 + $0x280]] }
  0xf7   :  { %v1173_v30 = vpop.eup %1172 }
  0xf8   :  { %v332_v31 = vmul.f32 %v1173_v30, %v1391_v22  ;;  %v152_v30 = vadd.f32 %v151_v28, %v148_v27  ;;  %v179_v27 = vmul.f32 %v178_v26, %v1367_v4 }
  0xfa   :  { %v333_v32 = vadd.f32 %v332_v31, %v1395_v29  ;;  %v180_v28 = vadd.f32 %v179_v27, %v1373_v7 }
  0xfc   :  { %336 = vrot.lane.b32.xlu0 %v333_v32, %s1260_s16  ;;  %v334_v35 = vmul.f32 0.0, %v333_v32 }
 0x16e   :  { %v337_v33 = vpop.permute.xlu0 %336 }
 0x16f   :  { %v339_v34 = vmul.f32 %v337_v33, %v333_v32 }
 0x171   :  { %341 = vrot.lane.b32.xlu0 %v339_v34, %s1261_s17 }
 0x1e3   :  { %v342_v36 = vpop.permute.xlu0 %341 }
 0x1e4   :  { %v344_v37 = vadd.f32 %v342_v36, %v334_v35 }
 0x1e6   :  { %1174 = vtanh.f32 %v344_v37 }
 0x1f3   :  { %v1175_v38 = vpop.eup %1174 }
 0x1f4   :  { %347 = vrot.lane.b32.xlu1 %v1175_v38, %s1260_s16 }
 0x266   :  { %v348_v39 = vpop.permute.xlu1 %347 }
 0x267   :  { %v1402_v40 = vmul.f32 %v348_v39, %v333_v32 }
 0x269   :  { %v357_v41 = vpack.c.bf16 %v1402_v40, %v1402_v40 }
 0x26b   :  { %359 = vrot.lane.b32.xlu1 %v357_v41, %s1261_s17 }
 0x2dd   :  { %v360_v42 = vpop.permute.xlu1 %359 }
 0x2de   :  { %1100 = vmatmul.mubr.msk.bf16.vlgmr.msra.gmra.mxu1 %vm285_vm4, %v360_v42 }
 0x2df   :  { %1112 = vmatpush3.bf16.msra.mxu1 %v1337_v0  ;;  %1115 = vmatprep.mubr.msk.bf16.mxu1 %vm1257_vm0, %v1256_v1 }
 0x2e0   :  { %1113 = vmatprep.subr.bf16.mxu1 %v1256_v1 }
 0x2e3   :  { %1114 = vmatpush3.bf16.msra.mxu1 %v1345_v2 }
 0x2e4   :  { %1127 = vmatprep.subr.bf16.mxu1 %v1256_v1 }
 0x39e   :  { %v398_v56 = vpop.f32.mrf.mxu1 }
 0x39f   :  { %v404_v57 = vadd.f32 %v398_v56, %v128_v55  ;;  %v160_v55 = vadd.f32 %v159_v54, %v156_v53  ;;  %v163_v56 = vld [vmem:[%s162_s26] sm:$0x1]  ;;  %s186_s26 = scalar_lea.vmem %s1673_s5, %s1025_s20  ;;  %s1031_s20 = sld [smem:[#allocation3 + $0x281]] }
 0x3a0   :  { %v1101_v58 = vpop.f32.mrf.mxu1 }
 0x3a1   :  { %v405_v59 = vmul.f32 %v404_v57, %v1391_v22  ;;  %v164_v57 = vadd.f32 %v163_v56, %v160_v55  ;;  %v167_v58 = vld [vmem:[%s166_s3] sm:$0x1]  ;;  %s190_s3 = scalar_lea.vmem %s1674_s6, %s1026_s24  ;;  %s1032_s24 = sld [smem:[#allocation3 + $0x282]] }
 0x3a2   :  { %v401_v60 = vpop.f32.mrf.mxu1 }
 0x3a3   :  { %1176 = vtanh.f32 %v405_v59  ;;  %v168_v59 = vadd.f32 %v167_v58, %v164_v57  ;;  %v171_v60 = vld [vmem:[%s170_s13] sm:$0x1]  ;;  %s194_s13 = scalar_lea.vmem %s1675_s7, %s1027_s27  ;;  %s1033_s27 = sld [smem:[#allocation3 + $0x283]] }
 0x3a4   :  { %v1102_v61 = vpop.f32.mrf.mxu1 }
 0x3a5   :  { %v172_v61 = vadd.f32 %v171_v60, %v168_v59 }
 0x3b0   :  { %v1177_v62 = vpop.eup %1176 }
 0x3b1   :  { %v407_v63 = vmul.f32 %v1177_v62, %v1391_v22  ;;  %v175_v62 = vld [vmem:[%s174_s15] sm:$0x1]  ;;  %s198_s15 = scalar_lea.vmem %s1676_s8, %s1028_s0  ;;  %s1034_s0 = sld [smem:[#allocation3 + $0x284]] }
 0x3b3   :  { %v408_v3 = vadd.f32 %v407_v63, %v1395_v29  ;;  %v176_v63 = vadd.f32 %v175_v62, %v172_v61  ;;  %v202_v61 = vstv %s1029_s18  ;;  %s1035_s18 = sld [smem:[#allocation6 + $0x300]] }
 0x3b4   :  { %v203_v62 = vmul.f32 %v202_v61, %v1367_v4 }
 0x3b5   :  { %411 = vrot.lane.b32.xlu0 %v408_v3, %s1260_s16  ;;  %v409_v8 = vmul.f32 %v408_v3, %v344_v37 }
 0x427   :  { %v412_v5 = vpop.permute.xlu0 %411 }
 0x428   :  { %v414_v6 = vmul.f32 %v412_v5, %v408_v3 }
 0x42a   :  { %416 = vrot.lane.b32.xlu1 %v414_v6, %s1261_s17 }
 0x49c   :  { %v417_v9 = vpop.permute.xlu1 %416 }
 0x49d   :  { %v419_v10 = vadd.f32 %v417_v9, %v409_v8 }
 0x49f   :  { %1178 = vtanh.f32 %v419_v10 }
 0x4ac   :  { %v1179_v11 = vpop.eup %1178 }
 0x4ad   :  { %422 = vrot.lane.b32.xlu0 %v1179_v11, %s1260_s16 }
 0x51f   :  { %v423_v12 = vpop.permute.xlu0 %422 }
 0x520   :  { %v1437_v13 = vmul.f32 %v423_v12, %v408_v3 }
 0x522   :  { %v431_v14 = vpack.c.bf16 %v1437_v13, %v1437_v13 }
 0x524   :  { %433 = vrot.lane.b32.xlu1 %v431_v14, %s1261_s17 }
 0x596   :  { %v434_v15 = vpop.permute.xlu1 %433 }
 0x597   :  { %1108 = vmatmul.mubr.msk.bf16.vlgmr.msra.gmra.mxu0 %vm285_vm4, %v434_v15 }
 0x598   :  { %1120 = vmatpush3.bf16.msra.mxu0 %v1337_v0  ;;  %1123 = vmatprep.mubr.msk.bf16.mxu0 %vm1257_vm0, %v1256_v1 }
 0x599   :  { %1121 = vmatprep.subr.bf16.mxu0 %v1256_v1 }
 0x59c   :  { %1122 = vmatpush3.bf16.msra.mxu0 %v1345_v2 }
 0x59d   :  { %1135 = vmatprep.subr.bf16.mxu0 %v1256_v1 }
 0x657   :  { %v472_v31 = vpop.f32.mrf.mxu0 }
 0x658   :  { %v478_v32 = vadd.f32 %v472_v31, %v152_v30  ;;  %v183_v30 = vld [vmem:[%s182_s23] sm:$0x1]  ;;  %s206_s23 = scalar_lea.vmem %s1672_s4, %s1030_s19  ;;  %s1036_s19 = sld [smem:[#allocation3 + $0x300]] }
 0x659   :  { %v1109_v33 = vpop.f32.mrf.mxu0  ;;  %v184_v31 = vadd.f32 %v183_v30, %v180_v28 }
 0x65a   :  { %v479_v34 = vmul.f32 %v478_v32, %v1391_v22  ;;  %v187_v32 = vld [vmem:[%s186_s26] sm:$0x1]  ;;  %s210_s26 = scalar_lea.vmem %s1673_s5, %s1031_s20  ;;  %s1037_s20 = sld [smem:[#allocation3 + $0x301]] }
 0x65b   :  { %v475_v35 = vpop.f32.mrf.mxu0  ;;  %v188_v33 = vadd.f32 %v187_v32, %v184_v31 }
 0x65c   :  { %1180 = vtanh.f32 %v479_v34  ;;  %v191_v34 = vld [vmem:[%s190_s3] sm:$0x1]  ;;  %s214_s3 = scalar_lea.vmem %s1674_s6, %s1032_s24  ;;  %s1038_s24 = sld [smem:[#allocation3 + $0x302]] }
 0x65d   :  { %v1110_v36 = vpop.f32.mrf.mxu0  ;;  %v192_v35 = vadd.f32 %v191_v34, %v188_v33 }
 0x65e   :  { %v195_v36 = vld [vmem:[%s194_s13] sm:$0x1]  ;;  %s218_s13 = scalar_lea.vmem %s1675_s7, %s1033_s27  ;;  %s1039_s27 = sld [smem:[#allocation3 + $0x303]] }
 0x669   :  { %v1181_v37 = vpop.eup %1180 }
 0x66a   :  { %v481_v38 = vmul.f32 %v1181_v37, %v1391_v22  ;;  %v196_v37 = vadd.f32 %v195_v36, %v192_v35  ;;  %v226_v36 = vstv %s1035_s18  ;;  %s1041_s18 = sld [smem:[#allocation6 + $0x380]] }
 0x66c   :  { %v482_v39 = vadd.f32 %v481_v38, %v1395_v29  ;;  %v199_v38 = vld [vmem:[%s198_s15] sm:$0x1]  ;;  %s222_s15 = scalar_lea.vmem %s1676_s8, %s1034_s0  ;;  %s1040_s0 = sld [smem:[#allocation3 + $0x304]] }
 0x66e   :  { %485 = vrot.lane.b32.xlu0 %v482_v39, %s1260_s16  ;;  %v483_v43 = vmul.f32 %v482_v39, %v419_v10 }
 0x6e0   :  { %v486_v41 = vpop.permute.xlu0 %485 }
 0x6e1   :  { %v488_v42 = vmul.f32 %v486_v41, %v482_v39 }
 0x6e3   :  { %490 = vrot.lane.b32.xlu1 %v488_v42, %s1261_s17 }
 0x755   :  { %v491_v44 = vpop.permute.xlu1 %490 }
 0x756   :  { %v493_v45 = vadd.f32 %v491_v44, %v483_v43 }
 0x758   :  { %1182 = vtanh.f32 %v493_v45 }
 0x765   :  { %v1183_v46 = vpop.eup %1182 }
 0x766   :  { %496 = vrot.lane.b32.xlu0 %v1183_v46, %s1260_s16 }
 0x7d8   :  { %v497_v47 = vpop.permute.xlu0 %496 }
 0x7d9   :  { %v1472_v48 = vmul.f32 %v497_v47, %v482_v39  ;;  %v200_v39 = vadd.f32 %v199_v38, %v196_v37  ;;  %v227_v37 = vmul.f32 %v226_v36, %v1367_v4 }
 0x7db   :  { %v505_v49 = vpack.c.bf16 %v1472_v48, %v1472_v48  ;;  %v228_v38 = vadd.f32 %v227_v37, %v1373_v7 }
 0x7dd   :  { %507 = vrot.lane.b32.xlu1 %v505_v49, %s1261_s17 }
 0x84f   :  { %v508_v50 = vpop.permute.xlu1 %507 }
 0x850   :  { %1116 = vmatmul.mubr.msk.bf16.vlgmr.msra.gmra.mxu1 %vm285_vm4, %v508_v50 }
 0x851   :  { %1128 = vmatpush3.bf16.msra.mxu1 %v1337_v0  ;;  %1131 = vmatprep.mubr.msk.bf16.mxu1 %vm1257_vm0, %v1256_v1 }
 0x852   :  { %1129 = vmatprep.subr.bf16.mxu1 %v1256_v1 }
 0x855   :  { %1130 = vmatpush3.bf16.msra.mxu1 %v1345_v2 }
 0x856   :  { %1143 = vmatprep.subr.bf16.mxu1 %v1256_v1 }
 0x910   :  { %v546_v3 = vpop.f32.mrf.mxu1 }
 0x911   :  { %v552_v5 = vadd.f32 %v546_v3, %v176_v63  ;;  %v207_v63 = vld [vmem:[%s206_s23] sm:$0x1]  ;;  %s230_s23 = scalar_lea.vmem %s1672_s4, %s1036_s19  ;;  %s1042_s19 = sld [smem:[#allocation3 + $0x380]] }
 0x912   :  { %v1117_v6 = vpop.f32.mrf.mxu1  ;;  %v211_v3 = vld [vmem:[%s210_s26] sm:$0x1]  ;;  %s234_s26 = scalar_lea.vmem %s1673_s5, %s1037_s20  ;;  %s1043_s20 = sld [smem:[#allocation3 + $0x381]] }
 0x913   :  { %v553_v8 = vmul.f32 %v552_v5, %v1391_v22  ;;  %v215_v6 = vld [vmem:[%s214_s3] sm:$0x1]  ;;  %s238_s3 = scalar_lea.vmem %s1674_s6, %s1038_s24  ;;  %s1044_s24 = sld [smem:[#allocation3 + $0x382]] }
 0x914   :  { %v549_v9 = vpop.f32.mrf.mxu1 }
 0x915   :  { %1184 = vtanh.f32 %v553_v8  ;;  %v219_v9 = vld [vmem:[%s218_s13] sm:$0x1]  ;;  %s242_s13 = scalar_lea.vmem %s1675_s7, %s1039_s27  ;;  %s1045_s27 = sld [smem:[#allocation3 + $0x383]] }
 0x916   :  { %v1118_v10 = vpop.f32.mrf.mxu1 }
 0x91b   :  { %s266_s30 = scalar_lea.vmem %s1675_s7, %s1045_s27 }
 0x922   :  { %v1185_v11 = vpop.eup %1184 }
 0x923   :  { %v555_v12 = vmul.f32 %v1185_v11, %v1391_v22  ;;  %v223_v11 = vld [vmem:[%s222_s15] sm:$0x1]  ;;  %s246_s15 = scalar_lea.vmem %s1676_s8, %s1040_s0  ;;  %s1046_s0 = sld [smem:[#allocation3 + $0x384]] }
 0x925   :  { %v556_v14 = vadd.f32 %v555_v12, %v1395_v29 }
 0x927   :  { %559 = vrot.lane.b32.xlu0 %v556_v14, %s1260_s16  ;;  %v557_v17 = vmul.f32 %v556_v14, %v493_v45 }
 0x999   :  { %v560_v15 = vpop.permute.xlu0 %559 }
 0x99a   :  { %v562_v16 = vmul.f32 %v560_v15, %v556_v14 }
 0x99c   :  { %564 = vrot.lane.b32.xlu1 %v562_v16, %s1261_s17 }
 0xa0e   :  { %v565_v18 = vpop.permute.xlu1 %564 }
 0xa0f   :  { %v567_v19 = vadd.f32 %v565_v18, %v557_v17 }
 0xa11   :  { %1186 = vtanh.f32 %v567_v19 }
 0xa1e   :  { %v1187_v20 = vpop.eup %1186 }
 0xa1f   :  { %570 = vrot.lane.b32.xlu0 %v1187_v20, %s1260_s16 }
 0xa91   :  { %v571_v21 = vpop.permute.xlu0 %570 }
 0xa92   :  { %v1507_v23 = vmul.f32 %v571_v21, %v556_v14 }
 0xa94   :  { %v579_v24 = vpack.c.bf16 %v1507_v23, %v1507_v23 }
 0xa96   :  { %581 = vrot.lane.b32.xlu1 %v579_v24, %s1261_s17 }
 0xb08   :  { %v582_v25 = vpop.permute.xlu1 %581 }
 0xb09   :  { %1124 = vmatmul.mubr.msk.bf16.vlgmr.msra.gmra.mxu0 %vm285_vm4, %v582_v25 }
 0xb0a   :  { %1136 = vmatpush3.bf16.msra.mxu0 %v1337_v0  ;;  %1139 = vmatprep.mubr.msk.bf16.mxu0 %vm1257_vm0, %v1256_v1 }
 0xb0b   :  { %1137 = vmatprep.subr.bf16.mxu0 %v1256_v1 }
 0xb0e   :  { %1138 = vmatpush3.bf16.msra.mxu0 %v1345_v2 }
 0xb0f   :  { %1151 = vmatprep.subr.bf16.mxu0 %v1256_v1 }
 0xbc9   :  { %v620_v41 = vpop.f32.mrf.mxu0 }
 0xbca   :  { %v626_v42 = vadd.f32 %v620_v41, %v200_v39  ;;  %v231_v39 = vld [vmem:[%s230_s23] sm:$0x1]  ;;  %s254_s23 = scalar_lea.vmem %s1672_s4, %s1042_s19 }
 0xbcb   :  { %v1125_v43 = vpop.f32.mrf.mxu0  ;;  %v232_v41 = vadd.f32 %v231_v39, %v228_v38 }
 0xbcc   :  { %v627_v44 = vmul.f32 %v626_v42, %v1391_v22  ;;  %v235_v42 = vld [vmem:[%s234_s26] sm:$0x1]  ;;  %s258_s26 = scalar_lea.vmem %s1673_s5, %s1043_s20  ;;  %s270_s5 = scalar_lea.vmem %s1676_s8, %s1046_s0 }
 0xbcd   :  { %v623_v45 = vpop.f32.mrf.mxu0  ;;  %v236_v43 = vadd.f32 %v235_v42, %v232_v41  ;;  %v1171_v42 = vld [vmem:[%s1678_s10] sm:$0xff]  }
 0xbce   :  { %1188 = vtanh.f32 %v627_v44  ;;  %v239_v44 = vld [vmem:[%s238_s3] sm:$0x1]  ;;  %s262_s3 = scalar_lea.vmem %s1674_s6, %s1044_s24 }
 0xbcf   :  { %v1126_v46 = vpop.f32.mrf.mxu0  ;;  %v240_v45 = vadd.f32 %v239_v44, %v236_v43 }
 0xbd0   :  { %v243_v46 = vld [vmem:[%s242_s13] sm:$0x1] }
 0xbdb   :  { %v1189_v47 = vpop.eup %1188 }
 0xbdc   :  { %v629_v49 = vmul.f32 %v1189_v47, %v1391_v22  ;;  %v244_v47 = vadd.f32 %v243_v46, %v240_v45 }
 0xbde   :  { %v630_v50 = vadd.f32 %v629_v49, %v1395_v29  ;;  %v247_v49 = vld [vmem:[%s246_s15] sm:$0x1] }
 0xbe0   :  { %633 = vrot.lane.b32.xlu0 %v630_v50, %s1260_s16  ;;  %v631_v53 = vmul.f32 %v630_v50, %v567_v19 }
 0xc52   :  { %v634_v51 = vpop.permute.xlu0 %633 }
 0xc53   :  { %v636_v52 = vmul.f32 %v634_v51, %v630_v50 }
 0xc55   :  { %638 = vrot.lane.b32.xlu1 %v636_v52, %s1261_s17 }
 0xcc7   :  { %v639_v54 = vpop.permute.xlu1 %638 }
 0xcc8   :  { %v641_v55 = vadd.f32 %v639_v54, %v631_v53 }
 0xcca   :  { %1190 = vtanh.f32 %v641_v55 }
 0xcd7   :  { %v1191_v56 = vpop.eup %1190 }
 0xcd8   :  { %644 = vrot.lane.b32.xlu0 %v1191_v56, %s1260_s16 }
 0xd4a   :  { %v645_v57 = vpop.permute.xlu0 %644 }
 0xd4b   :  { %v1542_v58 = vmul.f32 %v645_v57, %v630_v50  ;;  %v248_v50 = vadd.f32 %v247_v49, %v244_v47 }
 0xd4d   :  { %v653_v59 = vpack.c.bf16 %v1542_v58, %v1542_v58 }
 0xd4f   :  { %655 = vrot.lane.b32.xlu1 %v653_v59, %s1261_s17 }
 0xdc1   :  { %v656_v60 = vpop.permute.xlu1 %655 }
 0xdc2   :  { %1132 = vmatmul.mubr.msk.bf16.vlgmr.msra.gmra.mxu1 %vm285_vm4, %v656_v60 }
 0xdc3   :  { %1144 = vmatpush3.bf16.msra.mxu1 %v1337_v0  ;;  %1147 = vmatprep.mubr.msk.bf16.mxu1 %vm1257_vm0, %v1256_v1  ;;  %v204_v0 = vadd.f32 %v203_v62, %v1373_v7 }
 0xdc4   :  { %1145 = vmatprep.subr.bf16.mxu1 %v1256_v1 }
 0xdc7   :  { %1146 = vmatpush3.bf16.msra.mxu1 %v1345_v2  ;;  %v208_v2 = vadd.f32 %v207_v63, %v204_v0 }
 0xdc9   :  { %v212_v5 = vadd.f32 %v211_v3, %v208_v2 }
 0xdcb   :  { %v216_v8 = vadd.f32 %v215_v6, %v212_v5 }
 0xdcd   :  { %v220_v10 = vadd.f32 %v219_v9, %v216_v8 }
 0xdcf   :  { %v224_v12 = vadd.f32 %v223_v11, %v220_v10  ;;  %v250_v10 = vstv %s1041_s18 }
 0xdd0   :  { %v251_v11 = vmul.f32 %v250_v10, %v1367_v4 }
 0xe82   :  { %v694_v14 = vpop.f32.mrf.mxu1 }
 0xe83   :  { %v700_v15 = vadd.f32 %v694_v14, %v224_v12  ;;  %v252_v12 = vadd.f32 %v251_v11, %v1373_v7  ;;  %v255_v14 = vld [vmem:[%s254_s23] sm:$0x1] }
 0xe84   :  { %v1133_v16 = vpop.f32.mrf.mxu1 }
 0xe85   :  { %v701_v17 = vmul.f32 %v700_v15, %v1391_v22  ;;  %v256_v15 = vadd.f32 %v255_v14, %v252_v12  ;;  %v259_v16 = vld [vmem:[%s258_s26] sm:$0x1] }
 0xe86   :  { %v697_v18 = vpop.f32.mrf.mxu1 }
 0xe87   :  { %1192 = vtanh.f32 %v701_v17  ;;  %v260_v4 = vadd.f32 %v259_v16, %v256_v15  ;;  %v263_v17 = vld [vmem:[%s262_s3] sm:$0x1] }
 0xe88   :  { %v1134_v19 = vpop.f32.mrf.mxu1  ;;  %v267_v18 = vld [vmem:[%s266_s30] sm:$0x1] }
 0xe89   :  { %v264_v7 = vadd.f32 %v263_v17, %v260_v4 }
 0xe8b   :  { %v268_v19 = vadd.f32 %v267_v18, %v264_v7 }
 0xe94   :  { %v1193_v20 = vpop.eup %1192 }
 0xe95   :  { %v703_v21 = vmul.f32 %v1193_v20, %v1391_v22  ;;  %v271_v20 = vld [vmem:[%s270_s5] sm:$0x1] }
 0xe97   :  { %v704_v24 = vadd.f32 %v703_v21, %v1395_v29  ;;  %v272_v21 = vadd.f32 %v271_v20, %v268_v19 }
 0xe99   :  { %707 = vrot.lane.b32.xlu0 %v704_v24, %s1260_s16  ;;  %v705_v27 = vmul.f32 %v704_v24, %v641_v55 }
 0xf0b   :  { %v708_v25 = vpop.permute.xlu0 %707 }
 0xf0c   :  { %v710_v26 = vmul.f32 %v708_v25, %v704_v24 }
 0xf0e   :  { %712 = vrot.lane.b32.xlu1 %v710_v26, %s1261_s17 }
 0xf80   :  { %v713_v28 = vpop.permute.xlu1 %712 }
 0xf81   :  { %v715_v30 = vadd.f32 %v713_v28, %v705_v27 }
 0xf83   :  { %1194 = vtanh.f32 %v715_v30 }
 0xf90   :  { %v1195_v31 = vpop.eup %1194 }
 0xf91   :  { %718 = vrot.lane.b32.xlu0 %v1195_v31, %s1260_s16 }
0x1003   :  { %v719_v32 = vpop.permute.xlu0 %718 }
0x1004   :  { %v1576_v33 = vmul.f32 %v719_v32, %v704_v24 }
0x1006   :  { %v727_v34 = vpack.c.bf16 %v1576_v33, %v1576_v33 }
0x1008   :  { %729 = vrot.lane.b32.xlu1 %v727_v34, %s1261_s17 }
0x107a   :  { %v730_v35 = vpop.permute.xlu1 %729 }
0x107b   :  { %1140 = vmatmul.mubr.msk.bf16.vlgmr.msra.gmra.mxu0 %vm285_vm4, %v730_v35 }
0x107c   :  { %1155 = vmatprep.mubr.msk.bf16.mxu0 %vm1257_vm0, %v1256_v1 }
0x113b   :  { %v768_v51 = vpop.f32.mrf.mxu0 }
0x113c   :  { %v774_v52 = vadd.f32 %v768_v51, %v248_v50 }
0x113d   :  { %v1141_v53 = vpop.f32.mrf.mxu0 }
0x113e   :  { %v775_v54 = vmul.f32 %v774_v52, %v1391_v22 }
0x113f   :  { %v771_v55 = vpop.f32.mrf.mxu0 }
0x1140   :  { %1196 = vtanh.f32 %v775_v54 }
0x1141   :  { %v1142_v56 = vpop.f32.mrf.mxu0 }
0x114d   :  { %v1197_v57 = vpop.eup %1196 }
0x114e   :  { %v777_v59 = vmul.f32 %v1197_v57, %v1391_v22 }
0x1150   :  { %v778_v60 = vadd.f32 %v777_v59, %v1395_v29 }
0x1152   :  { %781 = vrot.lane.b32.xlu0 %v778_v60, %s1260_s16  ;;  %v779_v0 = vmul.f32 %v778_v60, %v715_v30 }
0x11c4   :  { %v782_v61 = vpop.permute.xlu0 %781 }
0x11c5   :  { %v784_v62 = vmul.f32 %v782_v61, %v778_v60 }
0x11c7   :  { %786 = vrot.lane.b32.xlu1 %v784_v62, %s1261_s17 }
0x1239   :  { %v787_v63 = vpop.permute.xlu1 %786 }
0x123a   :  { %v789_v2 = vadd.f32 %v787_v63, %v779_v0 }
0x123c   :  { %1198 = vtanh.f32 %v789_v2 }
0x1249   :  { %v1199_v3 = vpop.eup %1198 }
0x124a   :  { %792 = vrot.lane.b32.xlu0 %v1199_v3, %s1260_s16 }
0x12bc   :  { %v793_v5 = vpop.permute.xlu0 %792 }
0x12bd   :  { %v795_v6 = vmul.f32 %v793_v5, %v778_v60 }
0x12bf   :  { %v801_v8 = vpack.c.bf16 %v795_v6, %v795_v6 }
0x12c1   :  { %803 = vrot.lane.b32.xlu1 %v801_v8, %s1261_s17 }
0x1333   :  { %v804_v9 = vpop.permute.xlu1 %803 }
0x1334   :  { %1148 = vmatmul.mubr.msk.bf16.vlgmr.msra.gmra.mxu1 %vm285_vm4, %v804_v9 }
0x13f4   :  { %v842_v24 = vpop.f32.mrf.mxu1 }
0x13f5   :  { %v848_v25 = vadd.f32 %v842_v24, %v272_v21 }
0x13f6   :  { %v1149_v26 = vpop.f32.mrf.mxu1 }
0x13f7   :  { %v849_v27 = vmul.f32 %v848_v25, %v1391_v22 }
0x13f8   :  { %v845_v28 = vpop.f32.mrf.mxu1 }
0x13f9   :  { %1200 = vtanh.f32 %v849_v27 }
0x13fa   :  { %v1150_v30 = vpop.f32.mrf.mxu1 }
0x1406   :  { %v1201_v31 = vpop.eup %1200 }
0x1407   :  { %v851_v32 = vmul.f32 %v1201_v31, %v1391_v22 }
0x1409   :  { %v852_v34 = vadd.f32 %v851_v32, %v1395_v29 }
0x140b   :  { %855 = vrot.lane.b32.xlu0 %v852_v34, %s1260_s16  ;;  %v853_v22 = vmul.f32 %v852_v34, %v789_v2 }
0x147d   :  { %v856_v35 = vpop.permute.xlu0 %855 }
0x147e   :  { %v858_v36 = vmul.f32 %v856_v35, %v852_v34 }
0x1480   :  { %860 = vrot.lane.b32.xlu1 %v858_v36, %s1261_s17 }
0x1484   :  { %352 = vrot.lane.b32.xlu1 %v1402_v40, %s1261_s17 }
0x1488   :  { %501 = vrot.lane.b32.xlu1 %v1472_v48, %s1261_s17 }
0x148c   :  { %649 = vrot.lane.b32.xlu1 %v1542_v58, %s1261_s17  ;;  %v1170_v58 = vld [vmem:[%s1678_s10 + $0x8] sm:$0xff]  }
0x148d   :  { %1152 = vmatpush3.bf16.msra.mxu0 %v1170_v58 }
0x148e   :  { %1153 = vmatprep.subr.bf16.mxu0 %v1256_v1  ;;  %v1056_v1 = vld [vmem:[%s1679_s11] ss:$0 sm:$0xff] }
0x1490   :  { %797 = vrot.lane.b32.xlu1 %v795_v6, %s1261_s17 }
0x1491   :  { %1154 = vmatpush3.bf16.msra.mxu0 %v1171_v42 }
0x14f2   :  { %v861_v37 = vpop.permute.xlu1 %860 }
0x14f3   :  { %v863_v29 = vadd.f32 %v861_v37, %v853_v22 }
0x14f5   :  { %1202 = vtanh.f32 %v863_v29 }
0x14f6   :  { %v353_v38 = vpop.permute.xlu1 %352 }
0x14f7   :  { %356 = vst.msk [vmem:[#allocation2] sm:$0x1] %vm355_vm5, %v353_v38 }
0x14fa   :  { %v502_v39 = vpop.permute.xlu1 %501 }
0x14fb   :  { %504 = vst.msk [vmem:[#allocation2 + $0x2] sm:$0x1] %vm355_vm5, %v502_v39 }
0x14fe   :  { %v650_v40 = vpop.permute.xlu1 %649 }
0x14ff   :  { %652 = vst.msk [vmem:[#allocation2 + $0x4] sm:$0x1] %vm355_vm5, %v650_v40 }
0x1502   :  { %v1203_v48 = vpop.eup %1202  ;;  %v798_v41 = vpop.permute.xlu1 %797 }
0x1503   :  { %800 = vst.msk [vmem:[#allocation2 + $0x6] sm:$0x1] %vm355_vm5, %v798_v41  ;;  %866 = vrot.lane.b32.xlu0 %v1203_v48, %s1260_s16 }
0x1507   :  { %427 = vrot.lane.b32.xlu0 %v1437_v13, %s1261_s17 }
0x150b   :  { %575 = vrot.lane.b32.xlu0 %v1507_v23, %s1261_s17 }
0x150f   :  { %723 = vrot.lane.b32.xlu0 %v1576_v33, %s1261_s17 }
0x1575   :  { %v867_v43 = vpop.permute.xlu0 %866 }
0x1576   :  { %v869_v13 = vmul.f32 %v867_v43, %v852_v34 }
0x1578   :  { %871 = vrot.lane.b32.xlu0 %v869_v13, %s1261_s17  ;;  %s1262_s17 = smov [#allocation8]  }
0x1579   :  { %v428_v23 = vpop.permute.xlu0 %427  ;;  %s951_s15 = sshll.u32 %s1262_s17, 4  ;;  %s952_s15 = int_to_ptr.vmem [resolvable:$true] %s951_s15 }
0x157a   :  { %430 = vst.msk [vmem:[#allocation2 + $0x1] sm:$0x1] %vm355_vm5, %v428_v23  ;;  %s1228_s18 = scalar_lea.vmem %s952_s15, 128  ;;  %p1233_p11 = scmp.lt.s32.totalorder %s952_s15, %s952_s15 }
0x157b   :  { %p1229_p10 = scmp.ne.s32.totalorder %s952_s15, %s1228_s18  ;;  %p1234_p12 = scmp.lt.s32.totalorder %s1228_s18, %s1228_s18 }
0x157d   :  { %v576_v33 = vpop.permute.xlu0 %575  ;;  %p1235_p13 = por %p1234_p12, %p1233_p11 }
0x157e   :  { %578 = vst.msk [vmem:[#allocation2 + $0x3] sm:$0x1] %vm355_vm5, %v576_v33 }
0x157f   :  { %p1236_p0 = pnand %p1235_p13, %p1229_p10 }
0x1581   :  { %v724_v44 = vpop.permute.xlu0 %723 }
0x1582   :  { %726 = vst.msk [vmem:[#allocation2 + $0x5] sm:$0x1] %vm355_vm5, %v724_v44 }
0x15ea   :  { %v872_v45 = vpop.permute.xlu0 %871 }
0x15eb   :  { %874 = vst.msk [vmem:[#allocation2 + $0x7] sm:$0x1] %vm355_vm5, %v872_v45 }
0x15f2   :  { %v875_v46 = vld [vmem:[#allocation2] sm:$0xff] }
0x15f3   :  { %v876_v47 = vpack.c.bf16 %v875_v46, %v875_v46 }
0x15f5   :  { %1156 = vmatmul.mubr.msk.bf16.vlgmr.msra.gmra.mxu0 %vm285_vm4, %v876_v47 }
0x16b5   :  { %v937_v49 = vpop.f32.mrf.mxu0 }
0x16b6   :  { %v938_v50 = vadd.f32 %v1056_v1, %v937_v49 }
0x16b7   :  { %v1157_v51 = vpop.f32.mrf.mxu0 }
0x16b8   :  { %944 = vst.msk [vmem:[#allocation8] sm:$0xff] %vm943_vm6, %v938_v50 }
0x16b9   :  { %v940_v52 = vpop.f32.mrf.mxu0 }
0x16ba   :  { %1239 = shalt.err (!%p1236_p0)
}
0x16bb   :  { %954 = dma.vmem_to_hbm [thread:$0]  %s952_s15, 128, %s1680_s12, [#allocation4]   ;;  %v1158_v53 = vpop.f32.mrf.mxu0 }
0x16bc   :  { %1252 = dma.done.wait [#allocation4], 128  }
0x16bd   :  { %1253 = vsyncadd [#allocation4], 4294967168 }
0x16be   :  { %958 = vsyncpa [#allocation4], 1 }
0x16bf   :  { %959 = vsyncpa [#allocation5], 1 }
0x16c0   :  { %960 = vsyncpa [#allocation7], 1 }

</bundles_post_ra>
